<compile_context>
chip_gen: v5e
topology: v5e:2x2
jax: 0.10.0
libtpu: 0.0.40
codegen_flags: <defaults>
</compile_context>

<pallas_src>
import numpy as np
import jax
import jax.numpy as jnp
from jax.experimental import pallas as pl
from jax.experimental.pallas import tpu as pltpu

# ----------------------------- irreps bookkeeping ---------------------------
IRREPS_IN1 = [(8, 0), (8, 1)]              # (mul, l), all even parity
IRREPS_IN2 = [(1, 0), (1, 1)]
IRREPS_OUT_TP = [(8, 0), (8, 0), (8, 1)]   # scalars | gates | gated (Gate.irreps_in)


def _offsets(irreps):
    offs, o = [], 0
    for mul, l in irreps:
        offs.append(o)
        o += mul * (2 * l + 1)
    return offs, o


OFF1, D1 = _offsets(IRREPS_IN1)        # D1 = 32
OFF2, D2 = _offsets(IRREPS_IN2)        # D2 = 4
OFFO, DTP = _offsets(IRREPS_OUT_TP)    # DTP = 40

NS, NG = 8, 8                          # number of scalars / gates
NV = NG * 3                            # gated 1e dimension (24)
DOUT = NS + NV                         # 32 (final output per original row)

FOLD = 4                               # original rows folded into one lane-dense row
DF_IN = FOLD * D1                      # 128  folded x lanes
DF_Y = FOLD * D2                       # 16   folded y lanes
DF_OUT = FOLD * DOUT                   # 128  folded output lanes
KZ = D2 * DF_IN                        # 512  z lanes (in2-component major)
CW = 2 * DF_OUT                        # 256  fused-weight columns (value | sigmoid-arg)

assert DF_IN == 128 and DF_OUT == 128

# fully-connected 'uvw' instructions: (i_in1, i_in2, i_out) with ir_out in ir1*ir2
INSTRUCTIONS = [(0, 0, 0), (0, 0, 1), (0, 1, 2), (1, 0, 2),
                (1, 1, 0), (1, 1, 1), (1, 1, 2)]


def _cdiv(a, b):
    return -(-a // b)


def _round_up(a, b):
    return _cdiv(a, b) * b


def _w3j(l1, l2, lo):
    """Real Wigner-3j tensors (e3nn convention: Frobenius norm 1)."""
    if (l1, l2, lo) == (0, 0, 0):
        return np.ones((1, 1, 1))
    if (l1, l2, lo) == (0, 1, 1):
        return (np.eye(3) / np.sqrt(3.0)).reshape(1, 3, 3)
    if (l1, l2, lo) == (1, 0, 1):
        return (np.eye(3) / np.sqrt(3.0)).reshape(3, 1, 3)
    if (l1, l2, lo) == (1, 1, 0):
        return (np.eye(3) / np.sqrt(3.0)).reshape(3, 3, 1)
    if (l1, l2, lo) == (1, 1, 1):
        eps = np.zeros((3, 3, 3))
        eps[0, 1, 2] = eps[1, 2, 0] = eps[2, 0, 1] = 1.0
        eps[0, 2, 1] = eps[2, 1, 0] = eps[1, 0, 2] = -1.0
        return eps / np.sqrt(6.0)
    raise NotImplementedError((l1, l2, lo))


def build_w_eff(weights_flat, rescale=True):
    """Fold CG coefficients, 'component' normalization and 1/sqrt(fan_in) into a
    dense map W_eff[a, b, o]:  acc[n, o] = sum_{a,b} x[n, a] * y[n, b] * W_eff[a, b, o]."""
    slices_fan_in = {}
    for (i1, i2, io) in INSTRUCTIONS:                      # 'uvw' fan_in = mul1*mul2
        fan = IRREPS_IN1[i1][0] * IRREPS_IN2[i2][0]
        slices_fan_in[io] = slices_fan_in.get(io, 0) + fan
    sqrt_k = {io: (1.0 / np.sqrt(f) if rescale else 1.0)
              for io, f in slices_fan_in.items()}

    W = np.zeros((D1, D2, DTP), np.float32)
    woff = 0
    for (i1, i2, io) in INSTRUCTIONS:
        mul1, l1 = IRREPS_IN1[i1]
        mul2, l2 = IRREPS_IN2[i2]
        mulo, lo = IRREPS_OUT_TP[io]
        d1, d2, do = 2 * l1 + 1, 2 * l2 + 1, 2 * lo + 1
        n = mul1 * mul2 * mulo
        w = weights_flat[woff:woff + n].reshape(mul1, mul2, mulo)
        woff += n
        # TensorProductRescale weight rescale * 'component' irrep normalization
        # (path_normalization='none', path_weight=1.0, out_var=1)
        w = w * sqrt_k[io] * np.sqrt(do)
        C = _w3j(l1, l2, lo)
        block = np.einsum('uvw,ijk->uivjwk', w, C).reshape(
            mul1 * d1, mul2 * d2, mulo * do)
        W[OFF1[i1]:OFF1[i1] + mul1 * d1,
          OFF2[i2]:OFF2[i2] + mul2 * d2,
          OFFO[io]:OFFO[io] + mulo * do] += block
    assert woff == weights_flat.shape[0]
    return W
    # TODO(synk): this CG/rescale/'component' folding is validated only against the
    # in-script JAX reference; a bit-exact check against e3nn/PyTorch needs torch.


# --------------------- e3nn Activation normalize2mom constants --------------
def _second_moment(f, npts=100):
    x, w = np.polynomial.hermite.hermgauss(npts)
    z = np.sqrt(2.0) * x
    return float(np.sum(w * f(z) ** 2) / np.sqrt(np.pi))


_np_sigmoid = lambda z: 1.0 / (1.0 + np.exp(-z))
_np_silu = lambda z: z * _np_sigmoid(z)
# TODO(synk): e3nn's normalize2mom estimates E[f(z)^2] by fixed-seed Monte-Carlo;
# we use deterministic Gauss-Hermite quadrature (same quantity, not bit-identical).
C_SILU = _second_moment(_np_silu) ** -0.5
C_SIG = _second_moment(_np_sigmoid) ** -0.5


# ------------------------- folded / fused parameter build -------------------
def build_fused_params(W_eff, bias_s, bias_g):
    """Build the folded fused weight (KZ=512, CW=256), the y broadcast matrix
    (16, 512) and the fused bias row (1, 256).

    z layout   : z[m, b*128 + f*32 + a] = x[4m+f, a] * y[4m+f, b]
    acc layout : cols [0,128)   value slab   -> per fold f: [C_SILU*scal(8) | C_SIG*vec(24)]
                 cols [128,256) sigmoid slab -> per fold f: [scal(8) | gate_u replicated x3 (24)]
    final out  : out_f[m, f*32 + :] = value * sigmoid(sigmoid_arg)  (exact gate/silu semantics)."""
    W_local = np.transpose(W_eff, (1, 0, 2)).reshape(D2 * D1, DTP)   # [b*32+a, o]

    V_local = np.zeros((D2 * D1, DOUT), np.float32)   # value slab, per-row
    S_local = np.zeros((D2 * D1, DOUT), np.float32)   # sigmoid-arg slab, per-row
    V_local[:, :NS] = C_SILU * W_local[:, :NS]                       # scalars
    S_local[:, :NS] = W_local[:, :NS]
    for u in range(NG):
        V_local[:, NS + 3 * u:NS + 3 * u + 3] = \
            C_SIG * W_local[:, NS + NG + 3 * u:NS + NG + 3 * u + 3]  # gated 1e
        S_local[:, NS + 3 * u:NS + 3 * u + 3] = W_local[:, NS + u][:, None]  # gate, x3

    W_big = np.zeros((KZ, CW), np.float32)
    for f in range(FOLD):
        for b in range(D2):
            rows = slice(b * DF_IN + f * D1, b * DF_IN + f * D1 + D1)
            W_big[rows, f * DOUT:(f + 1) * DOUT] = V_local[b * D1:(b + 1) * D1, :]
            W_big[rows, DF_OUT + f * DOUT:DF_OUT + (f + 1) * DOUT] = \
                S_local[b * D1:(b + 1) * D1, :]

    bias_big = np.zeros((1, CW), np.float32)
    for f in range(FOLD):
        bias_big[0, f * DOUT:f * DOUT + NS] = C_SILU * bias_s
        bias_big[0, DF_OUT + f * DOUT:DF_OUT + f * DOUT + NS] = bias_s
        for u in range(NG):
            bias_big[0, DF_OUT + f * DOUT + NS + 3 * u:
                        DF_OUT + f * DOUT + NS + 3 * u + 3] = bias_g[u]

    # y broadcast: yexp[m, b*128 + f*32 + a] = y_f[m, f*4 + b]
    YB = np.zeros((DF_Y, KZ), np.float32)
    for f in range(FOLD):
        for b in range(D2):
            YB[f * D2 + b, b * DF_IN + f * D1:b * DF_IN + f * D1 + D1] = 1.0

    return W_big, YB, bias_big


# --------------------------------- kernel -----------------------------------
def _make_kernel(mxu_dtype):
    def kernel(x_ref, y_ref, yb_ref, w_ref, b_ref, o_ref):
        x = x_ref[...]                                     # (TN, 128)  lane-dense
        y = y_ref[...]                                     # (TN, 16)

        # y broadcast onto all 512 z lanes via a tiny 0/1 MXU matmul (MXU has slack)
        yexp = jnp.dot(y, yb_ref[...],
                       preferred_element_type=jnp.float32)          # (TN, 512)
        # x part of z: four 128-lane block copies (cheap vreg copies, no relayout)
        xt = jnp.concatenate([x] * D2, axis=-1)                      # (TN, 512)
        z = xt * yexp                                                # (TN, 512)

        w = w_ref[...]
        if mxu_dtype is not None:                          # e.g. bf16 for v5e MXU
            z = z.astype(mxu_dtype)
            w = w.astype(mxu_dtype)

        acc = jnp.dot(z, w, preferred_element_type=jnp.float32)      # (TN, 256)
        acc = acc + b_ref[...]                             # fused bias row (often zero)

        # cols [0,128): pre-scaled output values, cols [128,256): sigmoid arguments
        # (scalars for silu, gates replicated x3 for the gated vectors).
        # One full-128-lane sigmoid + one multiply + one unmasked 128-lane store.
        o_ref[...] = (acc[:, :DF_OUT] *
                      jax.nn.sigmoid(acc[:, DF_OUT:])).astype(o_ref.dtype)
    return kernel


def fctp_swish_gate(x, y, W_big, YB, bias_big, *, tn=1024, mxu_dtype=None):
    """x: (N, 32) f32, y: (N, 4) f32, W_big: (512, 256), YB: (16, 512),
    bias_big: (1, 256).  Returns (N, 32).  `tn` is the tile size in FOLDED rows
    (tn folded rows = 4*tn original rows)."""
    N = x.shape[0]
    nf = _cdiv(N, FOLD)                                    # folded rows needed
    # Keep at least 2 grid steps when possible (v7x has 2 TensorCores and the
    # batch axis is marked "parallel"); tile must be a multiple of 8 sublanes.
    tn_eff = max(8, int(min(tn, _round_up(_cdiv(nf, 2), 8))))
    nf_pad = _round_up(nf, tn_eff)
    n_pad = nf_pad * FOLD
    if n_pad != N:                                         # fold + tile remainder
        x = jnp.pad(x, ((0, n_pad - N), (0, 0)))
        y = jnp.pad(y, ((0, n_pad - N), (0, 0)))
    x_f = x.reshape(nf_pad, DF_IN)                         # lane-dense folded views
    y_f = y.reshape(nf_pad, DF_Y)

    grid = nf_pad // tn_eff
    out_f = pl.pallas_call(
        _make_kernel(mxu_dtype),
        out_shape=jax.ShapeDtypeStruct((nf_pad, DF_OUT), jnp.float32),
        grid_spec=pltpu.PrefetchScalarGridSpec(
            num_scalar_prefetch=0,
            grid=(grid,),
            in_specs=[
                pl.BlockSpec((tn_eff, DF_IN), lambda i: (i, 0)),
                pl.BlockSpec((tn_eff, DF_Y), lambda i: (i, 0)),
                pl.BlockSpec((DF_Y, KZ), lambda i: (0, 0)),     # resident across steps
                pl.BlockSpec((KZ, CW), lambda i: (0, 0)),       # resident across steps
                pl.BlockSpec((1, CW), lambda i: (0, 0)),        # resident across steps
            ],
            out_specs=pl.BlockSpec((tn_eff, DF_OUT), lambda i: (i, 0)),
        ),
        compiler_params=pltpu.CompilerParams(
            dimension_semantics=("parallel",)),
    )(x_f, y_f, YB, W_big, bias_big)

    out = out_f.reshape(n_pad, DOUT)
    return out[:N] if n_pad != N else out


# ------------------------------ pure-JAX reference --------------------------
def reference(x, y, W_eff, bias_s, bias_g):
    acc = jnp.einsum('na,nb,abo->no', x, y, jnp.asarray(W_eff),
                     precision=jax.lax.Precision.HIGHEST)
    acc = acc.at[:, :NS].add(jnp.asarray(bias_s))
    acc = acc.at[:, NS:NS + NG].add(jnp.asarray(bias_g))
    scal = C_SILU * jax.nn.silu(acc[:, :NS])
    gate = C_SIG * jax.nn.sigmoid(acc[:, NS:NS + NG])
    vec = acc[:, NS + NG:].reshape(-1, NG, 3) * gate[:, :, None]
    return jnp.concatenate([scal, vec.reshape(-1, NV)], axis=-1)


if __name__ == "__main__":
    key = jax.random.PRNGKey(0)
    kx, ky, kw, kb = jax.random.split(key, 4)

    # deliberately NOT a multiple of FOLD (or of the tile) -> exercises both the
    # fold padding and the tile padding; with the default tn the wrapper caps the
    # tile so the grid keeps 2 steps (v7x megacore sharding).
    N = 1002
    x = jax.random.normal(kx, (N, D1), dtype=jnp.float32)   # (1002, 32)
    y = jax.random.normal(ky, (N, D2), dtype=jnp.float32)   # (1002, 4)

    # internal 'uvw' tensor-product weights: sum(mul1*mul2*mul_out) = 448
    n_weights = sum(IRREPS_IN1[i1][0] * IRREPS_IN2[i2][0] * IRREPS_OUT_TP[io][0]
                    for (i1, i2, io) in INSTRUCTIONS)
    w_flat = np.asarray(jax.random.normal(kw, (n_weights,), dtype=jnp.float32))
    W_eff = build_w_eff(w_flat, rescale=True)               # (32, 4, 40)

    # bias parameters on the 0e block (zero-initialized in the module; small
    # random values here so the fused-bias path is actually validated).
    bvals = 0.1 * np.asarray(jax.random.normal(kb, (NS + NG,), dtype=jnp.float32))
    bias_s, bias_g = bvals[:NS], bvals[NS:]

    W_big, YB, bias_big = build_fused_params(W_eff, bias_s, bias_g)

    out = jax.block_until_ready(
        fctp_swish_gate(x, y, jnp.asarray(W_big), jnp.asarray(YB),
                        jnp.asarray(bias_big)))
    ref = jax.block_until_ready(reference(x, y, W_eff, bias_s, bias_g))
    np.testing.assert_allclose(np.asarray(out), np.asarray(ref),
                               rtol=1e-3, atol=1e-3)
    print("KERNEL_OK")
</pallas_src>

<mosaic_0001>
module attributes {stable_mosaic.version = 11 : i64} {
  func.func @kernel(%arg0: i32, %arg1: memref<128x128xf32, #tpu.memory_space<vmem>>, %arg2: memref<128x16xf32, #tpu.memory_space<vmem>>, %arg3: memref<16x512xf32, #tpu.memory_space<vmem>>, %arg4: memref<512x256xf32, #tpu.memory_space<vmem>>, %arg5: memref<1x256xf32, #tpu.memory_space<vmem>>, %arg6: memref<128x128xf32, #tpu.memory_space<vmem>>) attributes {dimension_semantics = [#tpu.dimension_semantics<parallel>], iteration_bounds = array<i64: 2>, scalar_prefetch = 0 : i64, scratch_operands = 0 : i64, tpu.core_type = #tpu.core_type<tc>, window_params = [{transform_indices = @transform_0, window_bounds = array<i64: 128, 128>}, {transform_indices = @transform_1, window_bounds = array<i64: 128, 16>}, {pipeline_mode = #tpu.pipeline_mode<synchronous>, transform_indices = @transform_2, window_bounds = array<i64: 16, 512>}, {pipeline_mode = #tpu.pipeline_mode<synchronous>, transform_indices = @transform_3, window_bounds = array<i64: 512, 256>}, {pipeline_mode = #tpu.pipeline_mode<synchronous>, transform_indices = @transform_4, window_bounds = array<i64: 1, 256>}, {transform_indices = @transform_5, window_bounds = array<i64: 128, 128>}]} {
    %c0 = arith.constant 0 : index
    %c0_0 = arith.constant 0 : index
    %0 = vector.load %arg1[%c0, %c0_0] : memref<128x128xf32, #tpu.memory_space<vmem>>, vector<128x128xf32>
    %c0_1 = arith.constant 0 : index
    %c0_2 = arith.constant 0 : index
    %1 = vector.load %arg2[%c0_1, %c0_2] : memref<128x16xf32, #tpu.memory_space<vmem>>, vector<128x16xf32>
    %c0_3 = arith.constant 0 : index
    %c0_4 = arith.constant 0 : index
    %2 = vector.load %arg3[%c0_3, %c0_4] : memref<16x512xf32, #tpu.memory_space<vmem>>, vector<16x512xf32>
    %cst = arith.constant dense<0.000000e+00> : vector<128x512xf32>
    %3 = tpu.matmul %1, %2, %cst {dimension_numbers = #tpu.dot_dimension_numbers<[1], [0], [0], [1], [0, 0, 1, 1], [], []>} : vector<128x16xf32>, vector<16x512xf32>, vector<128x512xf32> -> vector<128x512xf32>
    %4 = tpu.concatenate %0, %0, %0, %0 in 1 : vector<128x128xf32>, vector<128x128xf32>, vector<128x128xf32>, vector<128x128xf32> -> vector<128x512xf32>
    %5 = arith.mulf %4, %3 : vector<128x512xf32>
    %c0_5 = arith.constant 0 : index
    %c0_6 = arith.constant 0 : index
    %6 = vector.load %arg4[%c0_5, %c0_6] : memref<512x256xf32, #tpu.memory_space<vmem>>, vector<512x256xf32>
    %cst_7 = arith.constant dense<0.000000e+00> : vector<128x256xf32>
    %7 = tpu.matmul %5, %6, %cst_7 {dimension_numbers = #tpu.dot_dimension_numbers<[1], [0], [0], [1], [0, 0, 1, 1], [], []>} : vector<128x512xf32>, vector<512x256xf32>, vector<128x256xf32> -> vector<128x256xf32>
    %c0_8 = arith.constant 0 : index
    %c0_9 = arith.constant 0 : index
    %8 = vector.load %arg5[%c0_8, %c0_9] : memref<1x256xf32, #tpu.memory_space<vmem>>, vector<1x256xf32>
    %9 = vector.broadcast %8 : vector<1x256xf32> to vector<128x256xf32>
    %10 = arith.addf %7, %9 : vector<128x256xf32>
    %11 = vector.extract_strided_slice %10 {offsets = [0, 0], sizes = [128, 128], strides = [1, 1]} : vector<128x256xf32> to vector<128x128xf32>
    %12 = vector.extract_strided_slice %10 {offsets = [0, 128], sizes = [128, 128], strides = [1, 1]} : vector<128x256xf32> to vector<128x128xf32>
    %13 = arith.negf %12 : vector<128x128xf32>
    %14 = math.exp %13 : vector<128x128xf32>
    %cst_10 = arith.constant 1.000000e+00 : f32
    %15 = vector.broadcast %cst_10 : f32 to vector<128x128xf32>
    %16 = arith.addf %15, %14 : vector<128x128xf32>
    %17 = arith.divf %15, %16 : vector<128x128xf32>
    %18 = arith.mulf %11, %17 : vector<128x128xf32>
    %c0_11 = arith.constant 0 : index
    %c0_12 = arith.constant 0 : index
    %19 = vector.load %arg6[%c0_11, %c0_12] : memref<128x128xf32, #tpu.memory_space<vmem>>, vector<128x128xf32>
    tpu.vector_store %arg6[%c0_11, %c0_12], %18 {strides = array<i32>} : memref<128x128xf32, #tpu.memory_space<vmem>>, vector<128x128xf32>,
    return
  }
  func.func @transform_0(%arg0: i32) -> (i32, i32) {
    %c0_i32 = arith.constant 0 : i32
    %c0_i32_0 = arith.constant 0 : i32
    return %arg0, %c0_i32 : i32, i32
  }
  func.func @transform_1(%arg0: i32) -> (i32, i32) {
    %c0_i32 = arith.constant 0 : i32
    %c0_i32_0 = arith.constant 0 : i32
    return %arg0, %c0_i32 : i32, i32
  }
  func.func @transform_2(%arg0: i32) -> (i32, i32) {
    %c0_i32 = arith.constant 0 : i32
    %c0_i32_0 = arith.constant 0 : i32
    %c0_i32_1 = arith.constant 0 : i32
    return %c0_i32, %c0_i32_0 : i32, i32
  }
  func.func @transform_3(%arg0: i32) -> (i32, i32) {
    %c0_i32 = arith.constant 0 : i32
    %c0_i32_0 = arith.constant 0 : i32
    %c0_i32_1 = arith.constant 0 : i32
    return %c0_i32, %c0_i32_0 : i32, i32
  }
  func.func @transform_4(%arg0: i32) -> (i32, i32) {
    %c0_i32 = arith.constant 0 : i32
    %c0_i32_0 = arith.constant 0 : i32
    %c0_i32_1 = arith.constant 0 : i32
    return %c0_i32, %c0_i32_0 : i32, i32
  }
  func.func @transform_5(%arg0: i32) -> (i32, i32) {
    %c0_i32 = arith.constant 0 : i32
    %c0_i32_0 = arith.constant 0 : i32
    return %arg0, %c0_i32 : i32, i32
  }
}

</mosaic_0001>

<bundles_post_ra>
// kernel: tpu_custom_call.1
= control target key start
LH: loop header
LB: loop body
LE: loop exit
PB: predicated region body
PF: predicated region fallthrough
CT: control target
= control target key end

     0   :  { %10 = vsyncpa [#allocation3], 0  ;;  %s2785_s0 = inlined_call_operand.vmem [shape: f32[256,128], index: 0, kind: input, shape index: {}]   ;;  %s2786_s1 = inlined_call_operand.vmem [shape: f32[256,16], index: 1, kind: input, shape index: {}]   ;;  %s2787_s2 = inlined_call_operand.hbm [shape: f32[16,512], index: 2, kind: input, shape index: {}]   ;;  %s2788_s3 = inlined_call_operand.hbm [shape: f32[512,256], index: 3, kind: input, shape index: {}]   ;;  %s2789_s4 = inlined_call_operand.vmem [shape: f32[1,256], index: 4, kind: input, shape index: {}]   ;;  %s2790_s5 = inlined_call_operand.hbm [shape: f32[256,128], index: 5, kind: output, shape index: {}]  }
   0x1   :  { %11 = vsyncpa [#allocation6], 0 }
   0x2   :  { %12 = vsyncpa [#allocation4], 0 }
   0x3   :  { %14 = vsyncpa [#allocation4 + $0x1], 0  ;;  %s2196_s18 = smov 0   ;;  %s2198_s19 = smov 0  }
   0x4   :  { %s2200_s20 = smov 0   ;;  %s2202_s21 = smov 0  }
   0x5 LB: > { %s2217_s22 = sadd.s32 4294967295, %s2156_s21   ;;  %s1797_s23 = sadd.s32 4294967294, %s2156_s21   ;;  %s2156_s21 = sphi %s2202_s21, %s2836_s21   ;;  %s2152_s20 = sphi %s2200_s20, %s2835_s20   ;;  %s2148_s19 = sphi %s2198_s19, %s2834_s19   ;;  %s2144_s18 = sphi %s2196_s18, %s2833_s18  }
   0x6   : > { %s2221_s24 = sadd.s32 1, %s2156_s21   ;;  %s142_s25 = sadd.s32 1, %s2152_s20 }
   0x7   : > { %s139_s26 = ssub.s32 %s2156_s21, %s2221_s24  ;;  %p152_p0 = scmp.ne.s32.totalorder %s2152_s20, %s2148_s19 }
   0x8   : > { %p140_p1 = scmp.eq.s32.totalorder %s139_s26, 0  ;;  %p153_p2 = scmp.eq.s32.totalorder %s2217_s22, 1 }
   0x9   : > { %p158_p3 = scmp.ne.s32.totalorder %s2148_s19, %s2144_s18  ;;  %p159_p4 = scmp.eq.s32.totalorder %s1797_s23, 1 }
   0xa   : > { %s2232_s27 = scalar_select %p140_p1, %s2152_s20, %s142_s25  }
   0xb   : > { %p2234_p5 = por %p153_p2, %p152_p0  ;;  %p2238_p6 = por %p159_p4, %p158_p3 }
   0xc   : > { %p1798_p7 = scmp.ge.s32.totalorder %s2156_s21, 1  ;;  %p166_p8 = scmp.lt.s32.totalorder %s2156_s21, 3 }
   0xd   : > { %p1917_p9 = scmp.eq.s32.totalorder %s2217_s22, 0  ;;  %s177_s8 = sshll.u32 %s2787_s2, 4  ;;  %s178_s8 = int_to_ptr.hbm [resolvable:$true] %s177_s8 }
   0xe   : > { %p2245_p10 = pnand %p1798_p7, %p166_p8  ;;  %s2158_s9 = smov [#allocation2]  }
   0xf   : > { %s179_s10 = sshll.u32 %s2158_s9, 4  ;;  %s191_s13 = sshll.u32 %s2788_s3, 4  ;;  %s180_s10 = int_to_ptr.vmem [resolvable:$true] %s179_s10  ;;  %s192_s13 = int_to_ptr.hbm [resolvable:$true] %s191_s13 }
  0x10   : > { %p1906_p11 = pneg %p2245_p10  ;;  %s2159_s14 = smov 512  }
  0x11   : > { %s2160_s15 = smov 32   ;;  %s2161_s16 = smov [#allocation5]  }
  0x12   : > { %p1907_p12 = pnand %p1917_p9, %p1906_p11  ;;  %s193_s17 = sshll.u32 %s2161_s16, 4  ;;  %s194_s17 = int_to_ptr.vmem [resolvable:$true] %s193_s17 }
  0x13   : > { %s2162_s23 = smov 256   ;;  %s2163_s25 = smov 16  }
  0x14   : > { %1909 = dma.hbm_to_vmem [thread:$0]  (!%p1907_p12), %s178_s8, 1024, %s180_s10, [#allocation3], %s2159_s14, %s2159_s14, %s2160_s15  }
  0x15   : > { %1912 = dma.hbm_to_vmem [thread:$0]  (!%p1907_p12), %s192_s13, 16384, %s194_s17, [#allocation6], %s2162_s23, %s2162_s23, %s2163_s25  }
  0x16   : > { %230 = sbr.rel (%p2245_p10) target bundleno = 590 (0x24e), region = 40 }
  0x1b   : > { %2131 = dma.done.wait (%p1917_p9), [#allocation3], 1024  }
  0x1c   : > { %2133 = vsyncadd (%p1917_p9), [#allocation3], 4294966272 }
  0x1d   : > { %2135 = dma.done.wait (%p1917_p9), [#allocation6], 16384  }
  0x1e   : > { %2137 = vsyncadd (%p1917_p9), [#allocation6], 4294950912  ;;  %s1806_s26 = sshll.u32 %s2217_s22, 4  ;;  %v318_v0 = vld [vmem:[#allocation2 + $0x20] sm:$0xff]  ;;  %v319_v1 = vld [vmem:[#allocation2 + $0x28] sm:$0xff]  ;;  %vm322_vm0 = vcmask 130048  }
  0x1f   : > { %p270_p13 = scmp.lt.s32.totalorder %s1806_s26, 31  ;;  %v320_v2 = vld [vmem:[#allocation2 + $0x30] sm:$0xff]  ;;  %385 = vmatpush.msra.mxu0 %v318_v0  ;;  %450 = vmatpush.msra.mxu1 %v319_v1  ;;  %v321_v3 = vld [vmem:[#allocation2 + $0x38] sm:$0xff]  ;;  %v314_v4 = vld [vmem:[#allocation2] sm:$0xff]  ;;  %s266_s14 = sand.u32 1, %s2148_s19  }
  0x20   : > { %v315_v5 = vld [vmem:[#allocation2 + $0x8] sm:$0xff]  ;;  %515 = vmatpush.msra.mxu2 %v320_v2  ;;  %580 = vmatpush.msra.mxu3 %v321_v3  ;;  %v316_v6 = vld [vmem:[#allocation2 + $0x10] sm:$0xff]  ;;  %v317_v7 = vld [vmem:[#allocation2 + $0x18] sm:$0xff]  ;;  %s1805_s15 = sshll.u32 %s266_s14, 7  ;;  %s1895_s17 = sshll.u32 %s2217_s22, 7 }
  0x21   : > { %s2838_s26 = smov (!%p270_p13, %s1806_s26), 31  ;;  %386 = vmatpush.msra.mxu0 %v314_v4  ;;  %451 = vmatpush.msra.mxu1 %v315_v5  ;;  %v789_v9 = vld [vmem:[#allocation5 + $0x2f0] sm:$0xff]  ;;  %v787_v13 = vld [vmem:[#allocation5 + $0x2e0] sm:$0xff]  ;;  %s2707_s16 = scalar_lea.vmem [#allocation7], %s1805_s15 }
  0x22   : > { %s1807_s30 = sshll.u32 %s2838_s26, 3  ;;  %516 = vmatpush.msra.mxu2 %v316_v6  ;;  %581 = vmatpush.msra.mxu3 %v317_v7  ;;  %v725_v10 = vld [vmem:[#allocation5 + $0xf0] sm:$0xff]  ;;  %v723_v14 = vld [vmem:[#allocation5 + $0xe0] sm:$0xff]  ;;  %s1697_s26 = scalar_lea.hbm %s2790_s5, %s1895_s17 }
  0x23   : > { %s2278_s8 = scalar_lea.vmem %s2786_s1, %s1807_s30  ;;  %v821_v11 = vld [vmem:[#allocation5 + $0x3f0] sm:$0xff]  ;;  %829 = vmatpush.msrb.mxu0 %v725_v10  ;;  %v819_v15 = vld [vmem:[#allocation5 + $0x3e0] sm:$0xff]  ;;  %s2361_s11 = scalar_lea.vmem %s2785_s0, %s1807_s30 }
  0x24   : > { %v298_v8 = vld [vmem:[%s2278_s8] sm:$0xff]  ;;  %v757_v12 = vld [vmem:[#allocation5 + $0x1f0] sm:$0xff]  ;;  %959 = vmatpush.msrb.mxu2 %v789_v9  ;;  %1024 = vmatpush.msrb.mxu3 %v821_v11  ;;  %v299_v21 = vld [vmem:[%s2278_s8 + $0x8] sm:$0xff]  ;;  %s1698_s30 = sshll.u32 %s2707_s16, 4  ;;  %s1700_s22 = sshll.u32 %s1697_s26, 4  ;;  %s1699_s30 = int_to_ptr.vmem [resolvable:$true] %s1698_s30  ;;  %s1701_s22 = int_to_ptr.hbm [resolvable:$true] %s1700_s22 }
  0x25   : > { %1810 = vmatmul.msk.f32.vlgmr.msra.gmra.mxu0 %vm322_vm0, %v298_v8  ;;  %1826 = vmatmul.msk.f32.vlgmr.msra.gmra.mxu1 %vm322_vm0, %v298_v8  ;;  %v755_v16 = vld [vmem:[#allocation5 + $0x1e0] sm:$0xff]  ;;  %v785_v17 = vld [vmem:[#allocation5 + $0x2d0] sm:$0xff]  ;;  %v301_v36 = vld [vmem:[%s2278_s8 + $0x18] sm:$0xff]  ;;  %s1686_s6 = scalar_lea.sflag [#allocation4], %s266_s14  ;;  %s2100_s7 = sshra.s32 %s1701_s22, 4  ;;  %s2101_s7 = int_to_ptr.hbm [resolvable:$true] %s2100_s7 }
  0x26   : > { %1842 = vmatmul.msk.f32.vlgmr.msra.gmra.mxu2 %vm322_vm0, %v298_v8  ;;  %1858 = vmatmul.msk.f32.vlgmr.msra.gmra.mxu3 %vm322_vm0, %v298_v8  ;;  %v721_v18 = vld [vmem:[#allocation5 + $0xd0] sm:$0xff]  ;;  %v783_v22 = vld [vmem:[#allocation5 + $0x2c0] sm:$0xff]  ;;  %v303_v46 = vld [vmem:[%s2278_s8 + $0x28] sm:$0xff]  ;;  %p2107_p3 = scmp.lt.s32.totalorder %s2101_s7, %s2790_s5 }
  0x27   : > { %894 = vmatpush.msrb.mxu1 %v757_v12  ;;  %960 = vmatpush.msrb.mxu2 %v787_v13  ;;  %v817_v19 = vld [vmem:[#allocation5 + $0x3d0] sm:$0xff]  ;;  %v719_v23 = vld [vmem:[#allocation5 + $0xc0] sm:$0xff]  ;;  %v305_v56 = vld [vmem:[%s2278_s8 + $0x38] sm:$0xff] }
  0x28   : > { %830 = vmatpush.msrb.mxu0 %v723_v14  ;;  %v753_v20 = vld [vmem:[#allocation5 + $0x1d0] sm:$0xff]  ;;  %1025 = vmatpush.msrb.mxu3 %v819_v15  ;;  %v815_v24 = vld [vmem:[#allocation5 + $0x3c0] sm:$0xff]  ;;  %v307_v2 = vld [vmem:[%s2278_s8 + $0x48] sm:$0xff] }
  0x29   : > { %895 = vmatpush.msrb.mxu1 %v755_v16  ;;  %961 = vmatpush.msrb.mxu2 %v785_v17  ;;  %v751_v25 = vld [vmem:[#allocation5 + $0x1c0] sm:$0xff]  ;;  %v781_v26 = vld [vmem:[#allocation5 + $0x2b0] sm:$0xff]  ;;  %v309_v12 = vld [vmem:[%s2278_s8 + $0x58] sm:$0xff] }
  0x2a   : > { %831 = vmatpush.msrb.mxu0 %v721_v18  ;;  %1026 = vmatpush.msrb.mxu3 %v817_v19  ;;  %v717_v27 = vld [vmem:[#allocation5 + $0xb0] sm:$0xff]  ;;  %v779_v30 = vld [vmem:[#allocation5 + $0x2a0] sm:$0xff] }
  0x2b   : > { %896 = vmatpush.msrb.mxu1 %v753_v20  ;;  %962 = vmatpush.msrb.mxu2 %v783_v22  ;;  %v813_v28 = vld [vmem:[#allocation5 + $0x3b0] sm:$0xff]  ;;  %v715_v32 = vld [vmem:[#allocation5 + $0xa0] sm:$0xff]  ;;  %v790_v22 = vld [vmem:[#allocation5 + $0x2f8] sm:$0xff] }
  0x2c   : > { %832 = vmatpush.msrb.mxu0 %v719_v23  ;;  %v749_v29 = vld [vmem:[#allocation5 + $0x1b0] sm:$0xff]  ;;  %1027 = vmatpush.msrb.mxu3 %v815_v24  ;;  %v811_v33 = vld [vmem:[#allocation5 + $0x3a0] sm:$0xff]  ;;  %v726_v23 = vld [vmem:[#allocation5 + $0xf8] sm:$0xff] }
  0x2d   : > { %1811 = vmatmul.msk.f32.gmra.mxu0 %vm322_vm0, %v299_v21  ;;  %1827 = vmatmul.msk.f32.gmra.mxu1 %vm322_vm0, %v299_v21  ;;  %v300_v31 = vld [vmem:[%s2278_s8 + $0x10] sm:$0xff]  ;;  %v747_v34 = vld [vmem:[#allocation5 + $0x1a0] sm:$0xff]  ;;  %v822_v24 = vld [vmem:[#allocation5 + $0x3f8] sm:$0xff] }
  0x2e   : > { %1843 = vmatmul.msk.f32.gmra.mxu2 %vm322_vm0, %v299_v21  ;;  %1859 = vmatmul.msk.f32.gmra.mxu3 %vm322_vm0, %v299_v21  ;;  %v777_v35 = vld [vmem:[#allocation5 + $0x290] sm:$0xff]  ;;  %v775_v40 = vld [vmem:[#allocation5 + $0x280] sm:$0xff]  ;;  %v311_v21 = vld [vmem:[%s2278_s8 + $0x68] sm:$0xff] }
  0x2f   : > { %897 = vmatpush.msrb.mxu1 %v751_v25  ;;  %963 = vmatpush.msrb.mxu2 %v781_v26  ;;  %v713_v37 = vld [vmem:[#allocation5 + $0x90] sm:$0xff]  ;;  %v302_v41 = vld [vmem:[%s2278_s8 + $0x20] sm:$0xff]  ;;  %v758_v25 = vld [vmem:[#allocation5 + $0x1f8] sm:$0xff] }
  0x30   : > { %833 = vmatpush.msrb.mxu0 %v717_v27  ;;  %1028 = vmatpush.msrb.mxu3 %v813_v28  ;;  %v809_v38 = vld [vmem:[#allocation5 + $0x390] sm:$0xff]  ;;  %v711_v42 = vld [vmem:[#allocation5 + $0x80] sm:$0xff]  ;;  %v788_v27 = vld [vmem:[#allocation5 + $0x2e8] sm:$0xff] }
  0x31   : > { %898 = vmatpush.msrb.mxu1 %v749_v29  ;;  %964 = vmatpush.msrb.mxu2 %v779_v30  ;;  %v745_v39 = vld [vmem:[#allocation5 + $0x190] sm:$0xff]  ;;  %v807_v43 = vld [vmem:[#allocation5 + $0x380] sm:$0xff]  ;;  %v724_v28 = vld [vmem:[#allocation5 + $0xe8] sm:$0xff] }
  0x32   : > { %834 = vmatpush.msrb.mxu0 %v715_v32  ;;  %1029 = vmatpush.msrb.mxu3 %v811_v33  ;;  %v743_v44 = vld [vmem:[#allocation5 + $0x180] sm:$0xff]  ;;  %v773_v45 = vld [vmem:[#allocation5 + $0x270] sm:$0xff]  ;;  %v820_v29 = vld [vmem:[#allocation5 + $0x3e8] sm:$0xff] }
  0x33   : > { %899 = vmatpush.msrb.mxu1 %v747_v34  ;;  %965 = vmatpush.msrb.mxu2 %v777_v35  ;;  %v709_v47 = vld [vmem:[#allocation5 + $0x70] sm:$0xff]  ;;  %v771_v50 = vld [vmem:[#allocation5 + $0x260] sm:$0xff]  ;;  %v756_v30 = vld [vmem:[#allocation5 + $0x1e8] sm:$0xff] }
  0x34   : > { %835 = vmatpush.msrb.mxu0 %v713_v37  ;;  %1030 = vmatpush.msrb.mxu3 %v809_v38  ;;  %v805_v48 = vld [vmem:[#allocation5 + $0x370] sm:$0xff]  ;;  %v707_v52 = vld [vmem:[#allocation5 + $0x60] sm:$0xff]  ;;  %v786_v32 = vld [vmem:[#allocation5 + $0x2d8] sm:$0xff] }
  0x35   : > { %1812 = vmatmul.msk.f32.gmra.mxu0 %vm322_vm0, %v300_v31  ;;  %1828 = vmatmul.msk.f32.gmra.mxu1 %vm322_vm0, %v300_v31  ;;  %v741_v49 = vld [vmem:[#allocation5 + $0x170] sm:$0xff]  ;;  %v803_v53 = vld [vmem:[#allocation5 + $0x360] sm:$0xff]  ;;  %v722_v33 = vld [vmem:[#allocation5 + $0xd8] sm:$0xff] }
  0x36   : > { %1844 = vmatmul.msk.f32.gmra.mxu2 %vm322_vm0, %v300_v31  ;;  %1860 = vmatmul.msk.f32.gmra.mxu3 %vm322_vm0, %v300_v31  ;;  %v304_v51 = vld [vmem:[%s2278_s8 + $0x30] sm:$0xff]  ;;  %v739_v54 = vld [vmem:[#allocation5 + $0x160] sm:$0xff]  ;;  %v313_v31 = vld [vmem:[%s2278_s8 + $0x78] sm:$0xff] }
  0x37   : > { %900 = vmatpush.msrb.mxu1 %v745_v39  ;;  %966 = vmatpush.msrb.mxu2 %v775_v40  ;;  %v769_v55 = vld [vmem:[#allocation5 + $0x250] sm:$0xff]  ;;  %v767_v60 = vld [vmem:[#allocation5 + $0x240] sm:$0xff]  ;;  %v818_v34 = vld [vmem:[#allocation5 + $0x3d8] sm:$0xff] }
  0x38   : > { %836 = vmatpush.msrb.mxu0 %v711_v42  ;;  %1031 = vmatpush.msrb.mxu3 %v807_v43  ;;  %v705_v57 = vld [vmem:[#allocation5 + $0x50] sm:$0xff]  ;;  %v306_v61 = vld [vmem:[%s2278_s8 + $0x40] sm:$0xff]  ;;  %v754_v35 = vld [vmem:[#allocation5 + $0x1d8] sm:$0xff] }
  0x39   : > { %901 = vmatpush.msrb.mxu1 %v743_v44  ;;  %967 = vmatpush.msrb.mxu2 %v773_v45  ;;  %v801_v58 = vld [vmem:[#allocation5 + $0x350] sm:$0xff]  ;;  %v703_v62 = vld [vmem:[#allocation5 + $0x40] sm:$0xff]  ;;  %v720_v42 = vld [vmem:[#allocation5 + $0xc8] sm:$0xff] }
  0x3a   : > { %837 = vmatpush.msrb.mxu0 %v709_v47  ;;  %1032 = vmatpush.msrb.mxu3 %v805_v48  ;;  %v737_v59 = vld [vmem:[#allocation5 + $0x150] sm:$0xff]  ;;  %v799_v63 = vld [vmem:[#allocation5 + $0x340] sm:$0xff]  ;;  %v816_v43 = vld [vmem:[#allocation5 + $0x3c8] sm:$0xff] }
  0x3b   : > { %902 = vmatpush.msrb.mxu1 %v741_v49  ;;  %968 = vmatpush.msrb.mxu2 %v771_v50  ;;  %v735_v0 = vld [vmem:[#allocation5 + $0x140] sm:$0xff]  ;;  %v765_v1 = vld [vmem:[#allocation5 + $0x230] sm:$0xff]  ;;  %v752_v44 = vld [vmem:[#allocation5 + $0x1c8] sm:$0xff] }
  0x3c   : > { %838 = vmatpush.msrb.mxu0 %v707_v52  ;;  %1033 = vmatpush.msrb.mxu3 %v803_v53  ;;  %v701_v3 = vld [vmem:[#allocation5 + $0x30] sm:$0xff]  ;;  %v763_v6 = vld [vmem:[#allocation5 + $0x220] sm:$0xff]  ;;  %v283_v45 = vld [vmem:[%s2361_s11 + $0x8] sm:$0xff] }
  0x3d   : > { %1813 = vmatmul.msk.f32.gmra.mxu0 %vm322_vm0, %v301_v36  ;;  %1829 = vmatmul.msk.f32.gmra.mxu1 %vm322_vm0, %v301_v36  ;;  %v797_v4 = vld [vmem:[#allocation5 + $0x330] sm:$0xff]  ;;  %v699_v8 = vld [vmem:[#allocation5 + $0x20] sm:$0xff] }
  0x3e   : > { %1845 = vmatmul.msk.f32.gmra.mxu2 %vm322_vm0, %v301_v36  ;;  %1861 = vmatmul.msk.f32.gmra.mxu3 %vm322_vm0, %v301_v36  ;;  %v733_v5 = vld [vmem:[#allocation5 + $0x130] sm:$0xff]  ;;  %v795_v9 = vld [vmem:[#allocation5 + $0x320] sm:$0xff] }
  0x3f   : > { %903 = vmatpush.msrb.mxu1 %v739_v54  ;;  %969 = vmatpush.msrb.mxu2 %v769_v55  ;;  %v308_v7 = vld [vmem:[%s2278_s8 + $0x50] sm:$0xff]  ;;  %v731_v10 = vld [vmem:[#allocation5 + $0x120] sm:$0xff]  ;;  %v782_v54 = vld [vmem:[#allocation5 + $0x2b8] sm:$0xff] }
  0x40   : > { %839 = vmatpush.msrb.mxu0 %v705_v57  ;;  %1034 = vmatpush.msrb.mxu3 %v801_v58  ;;  %v761_v11 = vld [vmem:[#allocation5 + $0x210] sm:$0xff]  ;;  %v310_v16 = vld [vmem:[%s2278_s8 + $0x60] sm:$0xff]  ;;  %v718_v55 = vld [vmem:[#allocation5 + $0xb8] sm:$0xff] }
  0x41   : > { %904 = vmatpush.msrb.mxu1 %v737_v59  ;;  %970 = vmatpush.msrb.mxu2 %v767_v60  ;;  %v697_v13 = vld [vmem:[#allocation5 + $0x10] sm:$0xff]  ;;  %v759_v17 = vld [vmem:[#allocation5 + $0x200] sm:$0xff]  ;;  %v750_v57 = vld [vmem:[#allocation5 + $0x1b8] sm:$0xff] }
  0x42   : > { %840 = vmatpush.msrb.mxu0 %v703_v62  ;;  %1035 = vmatpush.msrb.mxu3 %v799_v63  ;;  %v793_v14 = vld [vmem:[#allocation5 + $0x310] sm:$0xff]  ;;  %v695_v18 = vld [vmem:[#allocation5] sm:$0xff] }
  0x43   : > { %905 = vmatpush.msrb.mxu1 %v735_v0  ;;  %971 = vmatpush.msrb.mxu2 %v765_v1  ;;  %v729_v15 = vld [vmem:[#allocation5 + $0x110] sm:$0xff]  ;;  %v727_v19 = vld [vmem:[#allocation5 + $0x100] sm:$0xff] }
  0x44   : > { %841 = vmatpush.msrb.mxu0 %v701_v3  ;;  %1036 = vmatpush.msrb.mxu3 %v797_v4  ;;  %v791_v20 = vld [vmem:[#allocation5 + $0x300] sm:$0xff]  ;;  %v312_v26 = vld [vmem:[%s2278_s8 + $0x70] sm:$0xff]  ;;  %v780_v3 = vld [vmem:[#allocation5 + $0x2a8] sm:$0xff]  ;;  %s2102_s8 = scalar_lea.hbm %s2101_s7, 128 }
  0x45   : > { %1814 = vmatmul.msk.f32.gmra.mxu0 %vm322_vm0, %v302_v41  ;;  %1830 = vmatmul.msk.f32.gmra.mxu1 %vm322_vm0, %v302_v41  ;;  %v282_v36 = vld [vmem:[%s2361_s11] sm:$0xff]  ;;  %v284_v58 = vld [vmem:[%s2361_s11 + $0x10] sm:$0xff]  ;;  %v716_v4 = vld [vmem:[#allocation5 + $0xa8] sm:$0xff]  ;;  %p2103_p0 = scmp.ne.s32.totalorder %s2101_s7, %s2102_s8 }
  0x46   : > { %1846 = vmatmul.msk.f32.gmra.mxu2 %vm322_vm0, %v302_v41  ;;  %1862 = vmatmul.msk.f32.gmra.mxu3 %vm322_vm0, %v302_v41  ;;  %v784_v41 = vld [vmem:[#allocation5 + $0x2c8] sm:$0xff] }
  0x47   : > { %906 = vmatpush.msrb.mxu1 %v733_v5  ;;  %972 = vmatpush.msrb.mxu2 %v763_v6  ;;  %v812_v5 = vld [vmem:[#allocation5 + $0x3a8] sm:$0xff]  ;;  %p2104_p1 = pnand %p2103_p0, %p2234_p5 }
  0x48   : > { %842 = vmatpush.msrb.mxu0 %v699_v8  ;;  %1037 = vmatpush.msrb.mxu3 %v795_v9  ;;  %v748_v6 = vld [vmem:[#allocation5 + $0x1a8] sm:$0xff] }
  0x49   : > { %907 = vmatpush.msrb.mxu1 %v731_v10  ;;  %973 = vmatpush.msrb.mxu2 %v761_v11  ;;  %p2105_p2 = pneg %p2104_p1 }
  0x4a   : > { %843 = vmatpush.msrb.mxu0 %v697_v13  ;;  %1038 = vmatpush.msrb.mxu3 %v793_v14 }
  0x4b   : > { %908 = vmatpush.msrb.mxu1 %v729_v15  ;;  %974 = vmatpush.msrb.mxu2 %v759_v17  ;;  %v714_v17 = vld [vmem:[#allocation5 + $0x98] sm:$0xff] }
  0x4c   : > { %844 = vmatpush.msrb.mxu0 %v695_v18  ;;  %1039 = vmatpush.msrb.mxu3 %v791_v20  ;;  %v810_v18 = vld [vmem:[#allocation5 + $0x398] sm:$0xff]  ;;  %v286_v20 = vld [vmem:[%s2361_s11 + $0x20] sm:$0xff] }
  0x4d   : > { %1815 = vmatmul.msk.f32.gmra.mxu0 %vm322_vm0, %v303_v46  ;;  %1831 = vmatmul.msk.f32.gmra.mxu1 %vm322_vm0, %v303_v46 }
  0x4e   : > { %1847 = vmatmul.msk.f32.gmra.mxu2 %vm322_vm0, %v303_v46  ;;  %1863 = vmatmul.msk.f32.gmra.mxu3 %vm322_vm0, %v303_v46 }
  0x4f   : > { %909 = vmatpush.msrb.mxu1 %v727_v19  ;;  %1219 = vmatpush.msra.mxu2 %v790_v22  ;;  %v746_v19 = vld [vmem:[#allocation5 + $0x198] sm:$0xff] }
  0x50   : > { %1089 = vmatpush.msra.mxu0 %v726_v23  ;;  %1284 = vmatpush.msra.mxu3 %v822_v24 }
  0x51   : > { %1154 = vmatpush.msra.mxu1 %v758_v25  ;;  %1220 = vmatpush.msra.mxu2 %v788_v27 }
  0x52   : > { %1090 = vmatpush.msra.mxu0 %v724_v28  ;;  %1285 = vmatpush.msra.mxu3 %v820_v29  ;;  %v776_v29 = vld [vmem:[#allocation5 + $0x288] sm:$0xff] }
  0x53   : > { %1155 = vmatpush.msra.mxu1 %v756_v30  ;;  %1221 = vmatpush.msra.mxu2 %v786_v32  ;;  %v712_v30 = vld [vmem:[#allocation5 + $0x88] sm:$0xff] }
  0x54   : > { %1091 = vmatpush.msra.mxu0 %v722_v33  ;;  %1286 = vmatpush.msra.mxu3 %v818_v34  ;;  %v744_v32 = vld [vmem:[#allocation5 + $0x188] sm:$0xff] }
  0x55   : > { %1816 = vmatmul.msk.f32.gmra.mxu0 %vm322_vm0, %v304_v51  ;;  %1832 = vmatmul.msk.f32.gmra.mxu1 %vm322_vm0, %v304_v51  ;;  %v287_v33 = vld [vmem:[%s2361_s11 + $0x28] sm:$0xff] }
  0x56   : > { %1848 = vmatmul.msk.f32.gmra.mxu2 %vm322_vm0, %v304_v51  ;;  %1864 = vmatmul.msk.f32.gmra.mxu3 %vm322_vm0, %v304_v51 }
  0x57   : > { %1156 = vmatpush.msra.mxu1 %v754_v35  ;;  %1222 = vmatpush.msra.mxu2 %v784_v41 }
  0x58   : > { %1092 = vmatpush.msra.mxu0 %v720_v42  ;;  %1287 = vmatpush.msra.mxu3 %v816_v43 }
  0x59   : > { %1157 = vmatpush.msra.mxu1 %v752_v44  ;;  %1223 = vmatpush.msra.mxu2 %v782_v54  ;;  %v774_v44 = vld [vmem:[#allocation5 + $0x278] sm:$0xff] }
  0x5a   : > { %1093 = vmatpush.msra.mxu0 %v718_v55 }
  0x5b   : > { %1158 = vmatpush.msra.mxu1 %v750_v57  ;;  %1224 = vmatpush.msra.mxu2 %v780_v3  ;;  %v804_v3 = vld [vmem:[#allocation5 + $0x368] sm:$0xff] }
  0x5c   : > { %1094 = vmatpush.msra.mxu0 %v716_v4  ;;  %v740_v4 = vld [vmem:[#allocation5 + $0x168] sm:$0xff] }
  0x5d   : > { %1817 = vmatmul.msk.f32.gmra.mxu0 %vm322_vm0, %v305_v56  ;;  %1833 = vmatmul.msk.f32.gmra.mxu1 %vm322_vm0, %v305_v56 }
  0x5e   : > { %1849 = vmatmul.msk.f32.gmra.mxu2 %vm322_vm0, %v305_v56  ;;  %1865 = vmatmul.msk.f32.gmra.mxu3 %vm322_vm0, %v305_v56  ;;  %v814_v56 = vld [vmem:[#allocation5 + $0x3b8] sm:$0xff] }
  0x5f   : > { %1288 = vmatpush.msra.mxu3 %v814_v56  ;;  %1159 = vmatpush.msra.mxu1 %v748_v6 }
  0x60   : > { %1095 = vmatpush.msra.mxu0 %v714_v17 }
  0x61   : > { %1289 = vmatpush.msra.mxu3 %v812_v5  ;;  %1160 = vmatpush.msra.mxu1 %v746_v19  ;;  %v289_v5 = vld [vmem:[%s2361_s11 + $0x38] sm:$0xff] }
  0x62   : > { %1096 = vmatpush.msra.mxu0 %v712_v30  ;;  %v706_v19 = vld [vmem:[#allocation5 + $0x58] sm:$0xff] }
  0x63   : > { %1290 = vmatpush.msra.mxu3 %v810_v18  ;;  %1161 = vmatpush.msra.mxu1 %v744_v32  ;;  %v770_v18 = vld [vmem:[#allocation5 + $0x258] sm:$0xff] }
  0x65   : > { %1818 = vmatmul.msk.f32.gmra.mxu0 %vm322_vm0, %v306_v61  ;;  %1834 = vmatmul.msk.f32.gmra.mxu1 %vm322_vm0, %v306_v61 }
  0x66   : > { %1850 = vmatmul.msk.f32.gmra.mxu2 %vm322_vm0, %v306_v61  ;;  %1866 = vmatmul.msk.f32.gmra.mxu3 %vm322_vm0, %v306_v61 }
  0x6d   : > { %1819 = vmatmul.msk.f32.gmra.mxu0 %vm322_vm0, %v307_v2  ;;  %1835 = vmatmul.msk.f32.gmra.mxu1 %vm322_vm0, %v307_v2 }
  0x6e   : > { %1851 = vmatmul.msk.f32.gmra.mxu2 %vm322_vm0, %v307_v2  ;;  %1867 = vmatmul.msk.f32.gmra.mxu3 %vm322_vm0, %v307_v2 }
  0x75   : > { %1820 = vmatmul.msk.f32.gmra.mxu0 %vm322_vm0, %v308_v7  ;;  %1836 = vmatmul.msk.f32.gmra.mxu1 %vm322_vm0, %v308_v7 }
  0x76   : > { %1852 = vmatmul.msk.f32.gmra.mxu2 %vm322_vm0, %v308_v7  ;;  %1868 = vmatmul.msk.f32.gmra.mxu3 %vm322_vm0, %v308_v7  ;;  %v285_v7 = vld [vmem:[%s2361_s11 + $0x18] sm:$0xff] }
  0x7d   : > { %1821 = vmatmul.msk.f32.gmra.mxu0 %vm322_vm0, %v309_v12  ;;  %1837 = vmatmul.msk.f32.gmra.mxu1 %vm322_vm0, %v309_v12 }
  0x7e   : > { %1853 = vmatmul.msk.f32.gmra.mxu2 %vm322_vm0, %v309_v12  ;;  %1869 = vmatmul.msk.f32.gmra.mxu3 %vm322_vm0, %v309_v12 }
  0x85   : > { %1822 = vmatmul.msk.f32.gmra.mxu0 %vm322_vm0, %v310_v16  ;;  %1838 = vmatmul.msk.f32.gmra.mxu1 %vm322_vm0, %v310_v16 }
  0x86   : > { %1854 = vmatmul.msk.f32.gmra.mxu2 %vm322_vm0, %v310_v16  ;;  %1870 = vmatmul.msk.f32.gmra.mxu3 %vm322_vm0, %v310_v16  ;;  %v778_v16 = vld [vmem:[#allocation5 + $0x298] sm:$0xff] }
  0x87   : > { %1225 = vmatpush.msra.mxu2 %v778_v16 }
  0x89   : > { %1226 = vmatpush.msra.mxu2 %v776_v29 }
  0x8b   : > { %1227 = vmatpush.msra.mxu2 %v774_v44  ;;  %v736_v44 = vld [vmem:[#allocation5 + $0x148] sm:$0xff] }
  0x8d   : > { %1823 = vmatmul.msk.f32.gmra.mxu0 %vm322_vm0, %v311_v21  ;;  %1839 = vmatmul.msk.f32.gmra.mxu1 %vm322_vm0, %v311_v21 }
  0x8e   : > { %1855 = vmatmul.msk.f32.gmra.mxu2 %vm322_vm0, %v311_v21  ;;  %1871 = vmatmul.msk.f32.gmra.mxu3 %vm322_vm0, %v311_v21 }
  0x95   : > { %1824 = vmatmul.msk.f32.gmra.mxu0 %vm322_vm0, %v312_v26  ;;  %1840 = vmatmul.msk.f32.gmra.mxu1 %vm322_vm0, %v312_v26 }
  0x96   : > { %1856 = vmatmul.msk.f32.gmra.mxu2 %vm322_vm0, %v312_v26  ;;  %1872 = vmatmul.msk.f32.gmra.mxu3 %vm322_vm0, %v312_v26 }
  0x9d   : > { %1825 = vmatmul.msk.f32.gmra.mxu0 %vm322_vm0, %v313_v31  ;;  %1841 = vmatmul.msk.f32.gmra.mxu1 %vm322_vm0, %v313_v31 }
  0x9e   : > { %1857 = vmatmul.msk.f32.gmra.mxu2 %vm322_vm0, %v313_v31  ;;  %1873 = vmatmul.msk.f32.gmra.mxu3 %vm322_vm0, %v313_v31  ;;  %v808_v31 = vld [vmem:[#allocation5 + $0x388] sm:$0xff] }
  0x9f   : > { %1291 = vmatpush.msra.mxu3 %v808_v31 }
  0xa2   : > { %v388_v37 = vpop.f32.mrf.mxu0  ;;  %v453_v38 = vpop.f32.mrf.mxu1 }
  0xa3   : > { %v2368_v39 = vmul.f32 %v388_v37, %v282_v36  ;;  %v2370_v40 = vmul.f32 %v453_v38, %v282_v36 }
  0xa5   : > { %845 = vmatmul.f32.vlgmr.msrb.gmra.mxu0 %v2368_v39  ;;  %910 = vmatmul.f32.vlgmr.msrb.gmra.mxu1 %v2370_v40 }
  0xa9   : > { %v518_v46 = vpop.f32.mrf.mxu2  ;;  %v583_v47 = vpop.f32.mrf.mxu3 }
  0xaa   : > { %v2375_v48 = vmul.f32 %v518_v46, %v282_v36  ;;  %v2377_v49 = vmul.f32 %v583_v47, %v282_v36  ;;  %v391_v50 = vpop.f32.mrf.mxu0  ;;  %v456_v51 = vpop.f32.mrf.mxu1  ;;  %v806_v46 = vld [vmem:[#allocation5 + $0x378] sm:$0xff] }
  0xab   : > { %v2379_v52 = vmul.f32 %v391_v50, %v283_v45  ;;  %v2381_v53 = vmul.f32 %v456_v51, %v283_v45  ;;  %v742_v47 = vld [vmem:[#allocation5 + $0x178] sm:$0xff]  ;;  %1292 = vmatpush.msra.mxu3 %v806_v46  ;;  %v288_v50 = vld [vmem:[%s2361_s11 + $0x30] sm:$0xff] }
  0xac   : > { %975 = vmatmul.f32.vlgmr.msrb.gmra.mxu2 %v2375_v48  ;;  %1040 = vmatmul.f32.vlgmr.msrb.gmra.mxu3 %v2377_v49 }
  0xad   : > { %848 = vmatmul.f32.gmra.mxu0 %v2379_v52  ;;  %913 = vmatmul.f32.gmra.mxu1 %v2381_v53 }
  0xae   : > { %1162 = vmatpush.msra.mxu1 %v742_v47  ;;  %1293 = vmatpush.msra.mxu3 %v804_v3  ;;  %v702_v3 = vld [vmem:[#allocation5 + $0x38] sm:$0xff] }
  0xb0   : > { %1163 = vmatpush.msra.mxu1 %v740_v4  ;;  %v798_v4 = vld [vmem:[#allocation5 + $0x338] sm:$0xff] }
  0xb1   : > { %v521_v59 = vpop.f32.mrf.mxu2  ;;  %v586_v60 = vpop.f32.mrf.mxu3 }
  0xb2   : > { %v394_v61 = vpop.f32.mrf.mxu0  ;;  %v459_v62 = vpop.f32.mrf.mxu1  ;;  %v2388_v63 = vmul.f32 %v521_v59, %v283_v45  ;;  %v2390_v0 = vmul.f32 %v586_v60, %v283_v45  ;;  %v710_v45 = vld [vmem:[#allocation5 + $0x78] sm:$0xff] }
  0xb3   : > { %v2392_v1 = vmul.f32 %v394_v61, %v284_v58  ;;  %v2394_v2 = vmul.f32 %v459_v62, %v284_v58  ;;  %1097 = vmatpush.msra.mxu0 %v710_v45  ;;  %v772_v61 = vld [vmem:[#allocation5 + $0x268] sm:$0xff] }
  0xb4   : > { %978 = vmatmul.f32.gmra.mxu2 %v2388_v63  ;;  %1043 = vmatmul.f32.gmra.mxu3 %v2390_v0  ;;  %v708_v62 = vld [vmem:[#allocation5 + $0x68] sm:$0xff] }
  0xb5   : > { %851 = vmatmul.f32.gmra.mxu0 %v2392_v1  ;;  %916 = vmatmul.f32.gmra.mxu1 %v2394_v2  ;;  %v291_v45 = vld [vmem:[%s2361_s11 + $0x48] sm:$0xff] }
  0xb6   : > { %1228 = vmatpush.msra.mxu2 %v772_v61  ;;  %1098 = vmatpush.msra.mxu0 %v708_v62  ;;  %v766_v62 = vld [vmem:[#allocation5 + $0x238] sm:$0xff] }
  0xb8   : > { %1229 = vmatpush.msra.mxu2 %v770_v18  ;;  %1099 = vmatpush.msra.mxu0 %v706_v19 }
  0xb9   : > { %v524_v8 = vpop.f32.mrf.mxu2  ;;  %v589_v9 = vpop.f32.mrf.mxu3 }
  0xba   : > { %v397_v10 = vpop.f32.mrf.mxu0  ;;  %v462_v11 = vpop.f32.mrf.mxu1  ;;  %v2401_v12 = vmul.f32 %v524_v8, %v284_v58  ;;  %v2403_v13 = vmul.f32 %v589_v9, %v284_v58 }
  0xbb   : > { %v2405_v14 = vmul.f32 %v397_v10, %v285_v7  ;;  %v2407_v15 = vmul.f32 %v462_v11, %v285_v7 }
  0xbc   : > { %981 = vmatmul.f32.gmra.mxu2 %v2401_v12  ;;  %1046 = vmatmul.f32.gmra.mxu3 %v2403_v13 }
  0xbd   : > { %854 = vmatmul.f32.gmra.mxu0 %v2405_v14  ;;  %919 = vmatmul.f32.gmra.mxu1 %v2407_v15 }
  0xc1   : > { %v527_v21 = vpop.f32.mrf.mxu2  ;;  %v592_v22 = vpop.f32.mrf.mxu3 }
  0xc2   : > { %v400_v23 = vpop.f32.mrf.mxu0  ;;  %v465_v24 = vpop.f32.mrf.mxu1  ;;  %v2414_v25 = vmul.f32 %v527_v21, %v285_v7  ;;  %v2416_v26 = vmul.f32 %v592_v22, %v285_v7  ;;  %v738_v21 = vld [vmem:[#allocation5 + $0x158] sm:$0xff]  ;;  %v290_v22 = vld [vmem:[%s2361_s11 + $0x40] sm:$0xff] }
  0xc3   : > { %v2418_v27 = vmul.f32 %v400_v23, %v286_v20  ;;  %v2420_v28 = vmul.f32 %v465_v24, %v286_v20  ;;  %1164 = vmatpush.msra.mxu1 %v738_v21 }
  0xc4   : > { %984 = vmatmul.f32.gmra.mxu2 %v2414_v25  ;;  %1049 = vmatmul.f32.gmra.mxu3 %v2416_v26 }
  0xc5   : > { %857 = vmatmul.f32.gmra.mxu0 %v2418_v27  ;;  %922 = vmatmul.f32.gmra.mxu1 %v2420_v28 }
  0xc6   : > { %1165 = vmatpush.msra.mxu1 %v736_v44 }
  0xc9   : > { %v530_v34 = vpop.f32.mrf.mxu2  ;;  %v595_v35 = vpop.f32.mrf.mxu3 }
  0xca   : > { %v403_v36 = vpop.f32.mrf.mxu0  ;;  %v468_v37 = vpop.f32.mrf.mxu1  ;;  %v2427_v38 = vmul.f32 %v530_v34, %v286_v20  ;;  %v2429_v41 = vmul.f32 %v595_v35, %v286_v20  ;;  %v802_v20 = vld [vmem:[#allocation5 + $0x358] sm:$0xff]  ;;  %v768_v35 = vld [vmem:[#allocation5 + $0x248] sm:$0xff] }
  0xcb   : > { %v2431_v42 = vmul.f32 %v403_v36, %v287_v33  ;;  %v2433_v43 = vmul.f32 %v468_v37, %v287_v33  ;;  %1294 = vmatpush.msra.mxu3 %v802_v20  ;;  %v704_v36 = vld [vmem:[#allocation5 + $0x48] sm:$0xff]  ;;  %1230 = vmatpush.msra.mxu2 %v768_v35  ;;  %v293_v35 = vld [vmem:[%s2361_s11 + $0x58] sm:$0xff] }
  0xcc   : > { %987 = vmatmul.f32.gmra.mxu2 %v2427_v38  ;;  %1052 = vmatmul.f32.gmra.mxu3 %v2429_v41  ;;  %v800_v37 = vld [vmem:[#allocation5 + $0x348] sm:$0xff] }
  0xcd   : > { %860 = vmatmul.f32.gmra.mxu0 %v2431_v42  ;;  %925 = vmatmul.f32.gmra.mxu1 %v2433_v43 }
  0xce   : > { %1100 = vmatpush.msra.mxu0 %v704_v36  ;;  %1295 = vmatpush.msra.mxu3 %v800_v37 }
  0xcf   : > { %1231 = vmatpush.msra.mxu2 %v766_v62  ;;  %v762_v62 = vld [vmem:[#allocation5 + $0x218] sm:$0xff] }
  0xd0   : > { %1101 = vmatpush.msra.mxu0 %v702_v3  ;;  %1296 = vmatpush.msra.mxu3 %v798_v4  ;;  %v698_v3 = vld [vmem:[#allocation5 + $0x18] sm:$0xff] }
  0xd1   : > { %v533_v51 = vpop.f32.mrf.mxu2  ;;  %v598_v54 = vpop.f32.mrf.mxu3  ;;  %v794_v4 = vld [vmem:[#allocation5 + $0x318] sm:$0xff] }
  0xd2   : > { %v406_v55 = vpop.f32.mrf.mxu0  ;;  %v471_v56 = vpop.f32.mrf.mxu1  ;;  %v2440_v57 = vmul.f32 %v533_v51, %v287_v33  ;;  %v2442_v58 = vmul.f32 %v598_v54, %v287_v33 }
  0xd3   : > { %v2444_v59 = vmul.f32 %v406_v55, %v288_v50  ;;  %v2446_v60 = vmul.f32 %v471_v56, %v288_v50 }
  0xd4   : > { %990 = vmatmul.f32.gmra.mxu2 %v2440_v57  ;;  %1055 = vmatmul.f32.gmra.mxu3 %v2442_v58 }
  0xd5   : > { %863 = vmatmul.f32.gmra.mxu0 %v2444_v59  ;;  %928 = vmatmul.f32.gmra.mxu1 %v2446_v60 }
  0xd9   : > { %v536_v6 = vpop.f32.mrf.mxu2  ;;  %v601_v7 = vpop.f32.mrf.mxu3 }
  0xda   : > { %v409_v8 = vpop.f32.mrf.mxu0  ;;  %v474_v9 = vpop.f32.mrf.mxu1  ;;  %v2453_v10 = vmul.f32 %v536_v6, %v288_v50  ;;  %v2455_v11 = vmul.f32 %v601_v7, %v288_v50  ;;  %v292_v6 = vld [vmem:[%s2361_s11 + $0x50] sm:$0xff] }
  0xdb   : > { %v2457_v16 = vmul.f32 %v409_v8, %v289_v5  ;;  %v2459_v17 = vmul.f32 %v474_v9, %v289_v5 }
  0xdc   : > { %993 = vmatmul.f32.gmra.mxu2 %v2453_v10  ;;  %1058 = vmatmul.f32.gmra.mxu3 %v2455_v11 }
  0xdd   : > { %866 = vmatmul.f32.gmra.mxu0 %v2457_v16  ;;  %931 = vmatmul.f32.gmra.mxu1 %v2459_v17 }
  0xe1   : > { %v539_v23 = vpop.f32.mrf.mxu2  ;;  %v604_v24 = vpop.f32.mrf.mxu3 }
  0xe2   : > { %v412_v29 = vpop.f32.mrf.mxu0  ;;  %v477_v30 = vpop.f32.mrf.mxu1  ;;  %v2466_v31 = vmul.f32 %v539_v23, %v289_v5  ;;  %v2468_v32 = vmul.f32 %v604_v24, %v289_v5  ;;  %v734_v5 = vld [vmem:[#allocation5 + $0x138] sm:$0xff]  ;;  %v764_v23 = vld [vmem:[#allocation5 + $0x228] sm:$0xff] }
  0xe3   : > { %v2470_v33 = vmul.f32 %v412_v29, %v290_v22  ;;  %v2472_v34 = vmul.f32 %v477_v30, %v290_v22  ;;  %1166 = vmatpush.msra.mxu1 %v734_v5  ;;  %v700_v24 = vld [vmem:[#allocation5 + $0x28] sm:$0xff]  ;;  %1232 = vmatpush.msra.mxu2 %v764_v23  ;;  %v730_v5 = vld [vmem:[#allocation5 + $0x118] sm:$0xff] }
  0xe4   : > { %996 = vmatmul.f32.gmra.mxu2 %v2466_v31  ;;  %1061 = vmatmul.f32.gmra.mxu3 %v2468_v32  ;;  %v796_v29 = vld [vmem:[#allocation5 + $0x328] sm:$0xff] }
  0xe5   : > { %869 = vmatmul.f32.gmra.mxu0 %v2470_v33  ;;  %934 = vmatmul.f32.gmra.mxu1 %v2472_v34  ;;  %v732_v30 = vld [vmem:[#allocation5 + $0x128] sm:$0xff] }
  0xe6   : > { %1102 = vmatpush.msra.mxu0 %v700_v24  ;;  %1297 = vmatpush.msra.mxu3 %v796_v29 }
  0xe7   : > { %1167 = vmatpush.msra.mxu1 %v732_v30  ;;  %1233 = vmatpush.msra.mxu2 %v762_v62 }
  0xe8   : > { %1103 = vmatpush.msra.mxu0 %v698_v3  ;;  %1298 = vmatpush.msra.mxu3 %v794_v4 }
  0xe9   : > { %v542_v46 = vpop.f32.mrf.mxu2  ;;  %v607_v47 = vpop.f32.mrf.mxu3  ;;  %1168 = vmatpush.msra.mxu1 %v730_v5 }
  0xea   : > { %v2479_v50 = vmul.f32 %v542_v46, %v290_v22  ;;  %v2481_v51 = vmul.f32 %v607_v47, %v290_v22  ;;  %v415_v54 = vpop.f32.mrf.mxu0  ;;  %v480_v55 = vpop.f32.mrf.mxu1 }
  0xeb   : > { %v2483_v56 = vmul.f32 %v415_v54, %v291_v45  ;;  %v2485_v61 = vmul.f32 %v480_v55, %v291_v45 }
  0xec   : > { %999 = vmatmul.f32.gmra.mxu2 %v2479_v50  ;;  %1064 = vmatmul.f32.gmra.mxu3 %v2481_v51 }
  0xed   : > { %872 = vmatmul.f32.gmra.mxu0 %v2483_v56  ;;  %937 = vmatmul.f32.gmra.mxu1 %v2485_v61 }
  0xf1   : > { %v545_v7 = vpop.f32.mrf.mxu2  ;;  %v610_v8 = vpop.f32.mrf.mxu3 }
  0xf2   : > { %v2492_v9 = vmul.f32 %v545_v7, %v291_v45  ;;  %v2494_v18 = vmul.f32 %v610_v8, %v291_v45  ;;  %v418_v19 = vpop.f32.mrf.mxu0  ;;  %v483_v20 = vpop.f32.mrf.mxu1 }
  0xf3   : > { %v2496_v21 = vmul.f32 %v418_v19, %v292_v6  ;;  %v2498_v22 = vmul.f32 %v483_v20, %v292_v6 }
  0xf4   : > { %1002 = vmatmul.f32.gmra.mxu2 %v2492_v9  ;;  %1067 = vmatmul.f32.gmra.mxu3 %v2494_v18 }
  0xf5   : > { %875 = vmatmul.f32.gmra.mxu0 %v2496_v21  ;;  %940 = vmatmul.f32.gmra.mxu1 %v2498_v22 }
  0xf9   : > { %v548_v36 = vpop.f32.mrf.mxu2  ;;  %v613_v37 = vpop.f32.mrf.mxu3 }
  0xfa   : > { %v2505_v44 = vmul.f32 %v548_v36, %v292_v6  ;;  %v2507_v45 = vmul.f32 %v613_v37, %v292_v6  ;;  %v421_v46 = vpop.f32.mrf.mxu0  ;;  %v486_v47 = vpop.f32.mrf.mxu1  ;;  %v294_v6 = vld [vmem:[%s2361_s11 + $0x60] sm:$0xff]  ;;  %v696_v36 = vld [vmem:[#allocation5 + $0x8] sm:$0xff] }
  0xfb   : > { %v2509_v54 = vmul.f32 %v421_v46, %v293_v35  ;;  %v2511_v55 = vmul.f32 %v486_v47, %v293_v35  ;;  %v728_v37 = vld [vmem:[#allocation5 + $0x108] sm:$0xff]  ;;  %1104 = vmatpush.msra.mxu0 %v696_v36  ;;  %v296_v36 = vld [vmem:[%s2361_s11 + $0x70] sm:$0xff] }
  0xfc   : > { %1005 = vmatmul.f32.gmra.mxu2 %v2505_v44  ;;  %1070 = vmatmul.f32.gmra.mxu3 %v2507_v45  ;;  %v760_v46 = vld [vmem:[#allocation5 + $0x208] sm:$0xff] }
  0xfd   : > { %878 = vmatmul.f32.gmra.mxu0 %v2509_v54  ;;  %943 = vmatmul.f32.gmra.mxu1 %v2511_v55  ;;  %v295_v47 = vld [vmem:[%s2361_s11 + $0x68] sm:$0xff] }
  0xfe   : > { %1234 = vmatpush.msra.mxu2 %v760_v46  ;;  %1169 = vmatpush.msra.mxu1 %v728_v37 }
 0x101   : > { %v551_v7 = vpop.f32.mrf.mxu2  ;;  %v616_v8 = vpop.f32.mrf.mxu3 }
 0x102   : > { %v2518_v19 = vmul.f32 %v551_v7, %v293_v35  ;;  %v2520_v20 = vmul.f32 %v616_v8, %v293_v35  ;;  %v424_v23 = vpop.f32.mrf.mxu0  ;;  %v489_v24 = vpop.f32.mrf.mxu1  ;;  %v792_v35 = vld [vmem:[#allocation5 + $0x308] sm:$0xff] }
 0x103   : > { %v2522_v29 = vmul.f32 %v424_v23, %v294_v6  ;;  %v2524_v30 = vmul.f32 %v489_v24, %v294_v6  ;;  %1299 = vmatpush.msra.mxu3 %v792_v35 }
 0x104   : > { %1008 = vmatmul.f32.gmra.mxu2 %v2518_v19  ;;  %1073 = vmatmul.f32.gmra.mxu3 %v2520_v20 }
 0x105   : > { %881 = vmatmul.f32.gmra.mxu0 %v2522_v29  ;;  %946 = vmatmul.f32.gmra.mxu1 %v2524_v30 }
 0x109   : > { %v554_v62 = vpop.f32.mrf.mxu2  ;;  %v619_v3 = vpop.f32.mrf.mxu3 }
 0x10a   : > { %v2531_v4 = vmul.f32 %v554_v62, %v294_v6  ;;  %v2533_v5 = vmul.f32 %v619_v3, %v294_v6  ;;  %v427_v7 = vpop.f32.mrf.mxu0  ;;  %v492_v8 = vpop.f32.mrf.mxu1 }
 0x10b   : > { %v2535_v23 = vmul.f32 %v427_v7, %v295_v47  ;;  %v2537_v24 = vmul.f32 %v492_v8, %v295_v47 }
 0x10c   : > { %2807 = vst [vmem:[#allocation11_spill] sm:$0xff] %v2531_v4  ;;  %1011 = vmatmul.f32.gmra.mxu2 %v2531_v4  ;;  %1076 = vmatmul.f32.gmra.mxu3 %v2533_v5 }
 0x10d   : > { %2808 = vst [vmem:[#allocation12_spill] sm:$0xff] %v2533_v5  ;;  %884 = vmatmul.f32.gmra.mxu0 %v2535_v23  ;;  %949 = vmatmul.f32.gmra.mxu1 %v2537_v24 }
 0x10e   : > { %2809 = vst [vmem:[#allocation13_spill] sm:$0xff] %v2535_v23 }
 0x10f   : > { %2810 = vst [vmem:[#allocation14_spill] sm:$0xff] %v2537_v24  ;;  %v297_v24 = vld [vmem:[%s2361_s11 + $0x78] sm:$0xff]  ;;  %s2106_s11 = scalar_lea.hbm %s2790_s5, 256 }
 0x110   : > { %p2108_p4 = scmp.lt.s32.totalorder %s2106_s11, %s2102_s8 }
 0x111   : > { %v557_v37 = vpop.f32.mrf.mxu2  ;;  %v622_v46 = vpop.f32.mrf.mxu3 }
 0x112   : > { %v2544_v6 = vmul.f32 %v557_v37, %v295_v47  ;;  %v2546_v35 = vmul.f32 %v622_v46, %v295_v47  ;;  %v430_v62 = vpop.f32.mrf.mxu0  ;;  %v495_v3 = vpop.f32.mrf.mxu1  ;;  %p2109_p7 = por %p2108_p4, %p2107_p3 }
 0x113   : > { %v2548_v7 = vmul.f32 %v430_v62, %v296_v36  ;;  %v2550_v8 = vmul.f32 %v495_v3, %v296_v36 }
 0x114   : > { %1014 = vmatmul.f32.gmra.mxu2 %v2544_v6  ;;  %1079 = vmatmul.f32.gmra.mxu3 %v2546_v35  ;;  %p2110_p8 = pnand %p2109_p7, %p2105_p2 }
 0x115   : > { %2811 = vst [vmem:[#allocation15_spill] sm:$0xff] %v2548_v7  ;;  %887 = vmatmul.f32.gmra.mxu0 %v2548_v7  ;;  %952 = vmatmul.f32.gmra.mxu1 %v2550_v8 }
 0x116   : > { %2812 = vst [vmem:[#allocation16_spill] sm:$0xff] %v2550_v8 }
 0x119   : > { %v560_v23 = vpop.f32.mrf.mxu2  ;;  %v625_v37 = vpop.f32.mrf.mxu3 }
 0x11a   : > { %v2557_v5 = vmul.f32 %v560_v23, %v296_v36  ;;  %v2559_v47 = vmul.f32 %v625_v37, %v296_v36  ;;  %v433_v46 = vpop.f32.mrf.mxu0  ;;  %v498_v62 = vpop.f32.mrf.mxu1  ;;  %v2572_v23 = vld [vmem:[%s2789_s4] sm:$0x3] }
 0x11b   : > { %v2561_v4 = vmul.f32 %v433_v46, %v297_v24  ;;  %v2563_v3 = vmul.f32 %v498_v62, %v297_v24  ;;  %2817 = vst [vmem:[#allocation21_spill] sm:$0xff] %v2572_v23 }
 0x11c   : > { %2813 = vst [vmem:[#allocation17_spill] sm:$0xff] %v2557_v5  ;;  %1017 = vmatmul.f32.gmra.mxu2 %v2557_v5  ;;  %1082 = vmatmul.f32.gmra.mxu3 %v2559_v47  ;;  %v2579_v5 = vperm.slane %v2572_v23, 0 }
 0x11d   : > { %2814 = vst [vmem:[#allocation18_spill] sm:$0xff] %v2559_v47  ;;  %890 = vmatmul.f32.gmra.mxu0 %v2561_v4  ;;  %955 = vmatmul.f32.gmra.mxu1 %v2563_v3 }
 0x11e   : > { %2815 = vst [vmem:[#allocation19_spill] sm:$0xff] %v2561_v4 }
 0x11f   : > { %2816 = vst [vmem:[#allocation20_spill] sm:$0xff] %v2563_v3 }
 0x121   : > { %v563_v8 = vpop.f32.mrf.mxu2  ;;  %v628_v7 = vpop.f32.mrf.mxu3 }
 0x122   : > { %v2574_v36 = vmul.f32 %v563_v8, %v297_v24  ;;  %v2576_v37 = vmul.f32 %v628_v7, %v297_v24  ;;  %v846_v46 = vpop.f32.mrf.mxu0  ;;  %v911_v62 = vpop.f32.mrf.mxu1 }
 0x123   : > { %v847_v3 = vadd.f32 %v846_v46, %v2579_v5 }
 0x124   : > { %2818 = vst [vmem:[#allocation22_spill] sm:$0xff] %v2574_v36  ;;  %1020 = vmatmul.f32.gmra.mxu2 %v2574_v36  ;;  %1085 = vmatmul.f32.gmra.mxu3 %v2576_v37 }
 0x125   : > { %2819 = vst [vmem:[#allocation23_spill] sm:$0xff] %v2576_v37  ;;  %1105 = vmatmul.f32.vlgmr.msra.gmra.mxu0 %v2368_v39  ;;  %1170 = vmatmul.f32.vlgmr.msra.gmra.mxu1 %v2370_v40  ;;  %v912_v47 = vadd.f32 %v911_v62, %v847_v3 }
 0x12a   : > { %v849_v4 = vpop.f32.mrf.mxu0  ;;  %v914_v8 = vpop.f32.mrf.mxu1 }
 0x12b   : > { %v850_v23 = vadd.f32 %v849_v4, %v2579_v5 }
 0x12c   : > { %1235 = vmatmul.f32.vlgmr.msra.gmra.mxu2 %v2375_v48  ;;  %1300 = vmatmul.f32.vlgmr.msra.gmra.mxu3 %v2377_v49 }
 0x12d   : > { %1108 = vmatmul.f32.gmra.mxu0 %v2379_v52  ;;  %1173 = vmatmul.f32.gmra.mxu1 %v2381_v53  ;;  %v915_v36 = vadd.f32 %v914_v8, %v850_v23 }
 0x12f   : > { %v976_v24 = vpop.f32.mrf.mxu2  ;;  %v1041_v7 = vpop.f32.mrf.mxu3 }
 0x130   : > { %v977_v39 = vadd.f32 %v976_v24, %v912_v47 }
 0x132   : > { %v2591_v37 = vadd.f32 %v1041_v7, %v977_v39  ;;  %v852_v40 = vpop.f32.mrf.mxu0  ;;  %v917_v46 = vpop.f32.mrf.mxu1 }
 0x133   : > { %v853_v52 = vadd.f32 %v852_v40, %v2579_v5 }
 0x134   : > { %1238 = vmatmul.f32.gmra.mxu2 %v2388_v63  ;;  %1303 = vmatmul.f32.gmra.mxu3 %v2390_v0 }
 0x135   : > { %1111 = vmatmul.f32.gmra.mxu0 %v2392_v1  ;;  %1176 = vmatmul.f32.gmra.mxu1 %v2394_v2  ;;  %v918_v62 = vadd.f32 %v917_v46, %v853_v52 }
 0x137   : > { %v979_v48 = vpop.f32.mrf.mxu2  ;;  %v1044_v49 = vpop.f32.mrf.mxu3 }
 0x138   : > { %v980_v53 = vadd.f32 %v979_v48, %v915_v36 }
 0x13a   : > { %v2598_v4 = vadd.f32 %v1044_v49, %v980_v53  ;;  %v855_v47 = vpop.f32.mrf.mxu0  ;;  %v920_v3 = vpop.f32.mrf.mxu1 }
 0x13b   : > { %v856_v1 = vadd.f32 %v855_v47, %v2579_v5 }
 0x13c   : > { %1241 = vmatmul.f32.gmra.mxu2 %v2401_v12  ;;  %1306 = vmatmul.f32.gmra.mxu3 %v2403_v13 }
 0x13d   : > { %1114 = vmatmul.f32.gmra.mxu0 %v2405_v14  ;;  %1179 = vmatmul.f32.gmra.mxu1 %v2407_v15  ;;  %v921_v24 = vadd.f32 %v920_v3, %v856_v1 }
 0x13f   : > { %v982_v63 = vpop.f32.mrf.mxu2  ;;  %v1047_v0 = vpop.f32.mrf.mxu3 }
 0x140   : > { %v983_v2 = vadd.f32 %v982_v63, %v918_v62 }
 0x142   : > { %v2605_v23 = vadd.f32 %v1047_v0, %v983_v2  ;;  %v858_v36 = vpop.f32.mrf.mxu0  ;;  %v923_v8 = vpop.f32.mrf.mxu1 }
 0x143   : > { %v859_v14 = vadd.f32 %v858_v36, %v2579_v5 }
 0x144   : > { %1244 = vmatmul.f32.gmra.mxu2 %v2414_v25  ;;  %1309 = vmatmul.f32.gmra.mxu3 %v2416_v26 }
 0x145   : > { %1117 = vmatmul.f32.gmra.mxu0 %v2418_v27  ;;  %1182 = vmatmul.f32.gmra.mxu1 %v2420_v28  ;;  %v924_v46 = vadd.f32 %v923_v8, %v859_v14 }
 0x147   : > { %v985_v12 = vpop.f32.mrf.mxu2  ;;  %v1050_v13 = vpop.f32.mrf.mxu3 }
 0x148   : > { %v986_v15 = vadd.f32 %v985_v12, %v921_v24 }
 0x14a   : > { %v2612_v7 = vadd.f32 %v1050_v13, %v986_v15  ;;  %v861_v39 = vpop.f32.mrf.mxu0  ;;  %v926_v40 = vpop.f32.mrf.mxu1 }
 0x14b   : > { %v862_v27 = vadd.f32 %v861_v39, %v2579_v5 }
 0x14c   : > { %1247 = vmatmul.f32.gmra.mxu2 %v2427_v38  ;;  %1312 = vmatmul.f32.gmra.mxu3 %v2429_v41 }
 0x14d   : > { %1120 = vmatmul.f32.gmra.mxu0 %v2431_v42  ;;  %1185 = vmatmul.f32.gmra.mxu1 %v2433_v43  ;;  %v927_v53 = vadd.f32 %v926_v40, %v862_v27 }
 0x14f   : > { %v988_v25 = vpop.f32.mrf.mxu2  ;;  %v1053_v26 = vpop.f32.mrf.mxu3 }
 0x150   : > { %v989_v28 = vadd.f32 %v988_v25, %v924_v46 }
 0x152   : > { %v2619_v48 = vadd.f32 %v1053_v26, %v989_v28  ;;  %v864_v49 = vpop.f32.mrf.mxu0  ;;  %v929_v52 = vpop.f32.mrf.mxu1 }
 0x153   : > { %v865_v42 = vadd.f32 %v864_v49, %v2579_v5 }
 0x154   : > { %1250 = vmatmul.f32.gmra.mxu2 %v2440_v57  ;;  %1315 = vmatmul.f32.gmra.mxu3 %v2442_v58 }
 0x155   : > { %1123 = vmatmul.f32.gmra.mxu0 %v2444_v59  ;;  %1188 = vmatmul.f32.gmra.mxu1 %v2446_v60  ;;  %v930_v63 = vadd.f32 %v929_v52, %v865_v42 }
 0x157   : > { %v991_v38 = vpop.f32.mrf.mxu2  ;;  %v1056_v41 = vpop.f32.mrf.mxu3 }
 0x158   : > { %v992_v43 = vadd.f32 %v991_v38, %v927_v53 }
 0x15a   : > { %v2626_v47 = vadd.f32 %v1056_v41, %v992_v43  ;;  %v867_v3 = vpop.f32.mrf.mxu0  ;;  %v932_v62 = vpop.f32.mrf.mxu1 }
 0x15b   : > { %v868_v59 = vadd.f32 %v867_v3, %v2579_v5 }
 0x15c   : > { %1253 = vmatmul.f32.gmra.mxu2 %v2453_v10  ;;  %1318 = vmatmul.f32.gmra.mxu3 %v2455_v11 }
 0x15d   : > { %1126 = vmatmul.f32.gmra.mxu0 %v2457_v16  ;;  %1191 = vmatmul.f32.gmra.mxu1 %v2459_v17  ;;  %v933_v8 = vadd.f32 %v932_v62, %v868_v59  ;;  %v2820_v62 = vld [vmem:[#allocation11_spill] sm:$0xff] }
 0x15f   : > { %v994_v57 = vpop.f32.mrf.mxu2  ;;  %v1059_v58 = vpop.f32.mrf.mxu3 }
 0x160   : > { %v995_v60 = vadd.f32 %v994_v57, %v930_v63  ;;  %v2821_v63 = vld [vmem:[#allocation12_spill] sm:$0xff]  ;;  %v2823_v57 = vld [vmem:[#allocation14_spill] sm:$0xff] }
 0x162   : > { %v2633_v0 = vadd.f32 %v1059_v58, %v995_v60  ;;  %v870_v1 = vpop.f32.mrf.mxu0  ;;  %v935_v2 = vpop.f32.mrf.mxu1 }
 0x163   : > { %v871_v36 = vadd.f32 %v870_v1, %v2579_v5 }
 0x164   : > { %1256 = vmatmul.f32.gmra.mxu2 %v2466_v31  ;;  %1321 = vmatmul.f32.gmra.mxu3 %v2468_v32 }
 0x165   : > { %v936_v10 = vadd.f32 %v935_v2, %v871_v36  ;;  %1129 = vmatmul.f32.gmra.mxu0 %v2470_v33  ;;  %1194 = vmatmul.f32.gmra.mxu1 %v2472_v34 }
 0x167   : > { %v997_v11 = vpop.f32.mrf.mxu2  ;;  %v1062_v16 = vpop.f32.mrf.mxu3 }
 0x168   : > { %v998_v17 = vadd.f32 %v997_v11, %v933_v8  ;;  %v2824_v8 = vld [vmem:[#allocation15_spill] sm:$0xff] }
 0x16a   : > { %v2640_v24 = vadd.f32 %v1062_v16, %v998_v17  ;;  %v873_v12 = vpop.f32.mrf.mxu0  ;;  %v938_v13 = vpop.f32.mrf.mxu1 }
 0x16b   : > { %v874_v14 = vadd.f32 %v873_v12, %v2579_v5 }
 0x16c   : > { %1259 = vmatmul.f32.gmra.mxu2 %v2479_v50  ;;  %1324 = vmatmul.f32.gmra.mxu3 %v2481_v51 }
 0x16d   : > { %v939_v31 = vadd.f32 %v938_v13, %v874_v14  ;;  %1132 = vmatmul.f32.gmra.mxu0 %v2483_v56  ;;  %1197 = vmatmul.f32.gmra.mxu1 %v2485_v61 }
 0x16f   : > { %v1000_v32 = vpop.f32.mrf.mxu2  ;;  %v1065_v33 = vpop.f32.mrf.mxu3 }
 0x170   : > { %v1001_v34 = vadd.f32 %v1000_v32, %v936_v10  ;;  %v2825_v10 = vld [vmem:[#allocation16_spill] sm:$0xff]  ;;  %v2826_v32 = vld [vmem:[#allocation17_spill] sm:$0xff] }
 0x172   : > { %v2647_v15 = vadd.f32 %v1065_v33, %v1001_v34  ;;  %v876_v39 = vpop.f32.mrf.mxu0  ;;  %v941_v40 = vpop.f32.mrf.mxu1  ;;  %v2827_v33 = vld [vmem:[#allocation18_spill] sm:$0xff]  ;;  %v2829_v34 = vld [vmem:[#allocation20_spill] sm:$0xff] }
 0x173   : > { %v877_v46 = vadd.f32 %v876_v39, %v2579_v5 }
 0x174   : > { %1262 = vmatmul.f32.gmra.mxu2 %v2492_v9  ;;  %1327 = vmatmul.f32.gmra.mxu3 %v2494_v18 }
 0x175   : > { %v942_v50 = vadd.f32 %v941_v40, %v877_v46  ;;  %1135 = vmatmul.f32.gmra.mxu0 %v2496_v21  ;;  %1200 = vmatmul.f32.gmra.mxu1 %v2498_v22 }
 0x177   : > { %v1003_v51 = vpop.f32.mrf.mxu2  ;;  %v1068_v56 = vpop.f32.mrf.mxu3 }
 0x178   : > { %v1004_v61 = vadd.f32 %v1003_v51, %v939_v31 }
 0x17a   : > { %v2654_v25 = vadd.f32 %v1068_v56, %v1004_v61  ;;  %v879_v26 = vpop.f32.mrf.mxu0  ;;  %v944_v27 = vpop.f32.mrf.mxu1  ;;  %v2830_v61 = vld [vmem:[#allocation22_spill] sm:$0xff] }
 0x17b   : > { %v880_v28 = vadd.f32 %v879_v26, %v2579_v5  ;;  %v2831_v26 = vld [vmem:[#allocation23_spill] sm:$0xff] }
 0x17c   : > { %1265 = vmatmul.f32.gmra.mxu2 %v2505_v44  ;;  %1330 = vmatmul.f32.gmra.mxu3 %v2507_v45 }
 0x17d   : > { %v945_v9 = vadd.f32 %v944_v27, %v880_v28  ;;  %1138 = vmatmul.f32.gmra.mxu0 %v2509_v54  ;;  %1203 = vmatmul.f32.gmra.mxu1 %v2511_v55 }
 0x17f   : > { %v1006_v18 = vpop.f32.mrf.mxu2  ;;  %v1071_v21 = vpop.f32.mrf.mxu3 }
 0x180   : > { %v1007_v22 = vadd.f32 %v1006_v18, %v942_v50 }
 0x182   : > { %v2661_v49 = vadd.f32 %v1071_v21, %v1007_v22  ;;  %v882_v52 = vpop.f32.mrf.mxu0  ;;  %v947_v53 = vpop.f32.mrf.mxu1 }
 0x183   : > { %v883_v38 = vadd.f32 %v882_v52, %v2579_v5 }
 0x184   : > { %1268 = vmatmul.f32.gmra.mxu2 %v2518_v19  ;;  %1333 = vmatmul.f32.gmra.mxu3 %v2520_v20  ;;  %v2822_v20 = vld [vmem:[#allocation13_spill] sm:$0xff] }
 0x185   : > { %v948_v44 = vadd.f32 %v947_v53, %v883_v38  ;;  %1141 = vmatmul.f32.gmra.mxu0 %v2522_v29  ;;  %1206 = vmatmul.f32.gmra.mxu1 %v2524_v30 }
 0x187   : > { %v1009_v45 = vpop.f32.mrf.mxu2  ;;  %v1074_v54 = vpop.f32.mrf.mxu3 }
 0x188   : > { %v1010_v55 = vadd.f32 %v1009_v45, %v945_v9 }
 0x18a   : > { %v2668_v41 = vadd.f32 %v1074_v54, %v1010_v55  ;;  %v885_v42 = vpop.f32.mrf.mxu0  ;;  %v950_v43 = vpop.f32.mrf.mxu1 }
 0x18b   : > { %v886_v3 = vadd.f32 %v885_v42, %v2579_v5 }
 0x18c   : > { %1271 = vmatmul.f32.gmra.mxu2 %v2820_v62  ;;  %1336 = vmatmul.f32.gmra.mxu3 %v2821_v63 }
 0x18d   : > { %v951_v19 = vadd.f32 %v950_v43, %v886_v3  ;;  %1144 = vmatmul.f32.gmra.mxu0 %v2822_v20  ;;  %1209 = vmatmul.f32.gmra.mxu1 %v2823_v57 }
 0x18f   : > { %v1012_v29 = vpop.f32.mrf.mxu2  ;;  %v1077_v30 = vpop.f32.mrf.mxu3 }
 0x190   : > { %v1013_v58 = vadd.f32 %v1012_v29, %v948_v44 }
 0x192   : > { %v2675_v59 = vadd.f32 %v1077_v30, %v1013_v58  ;;  %v888_v60 = vpop.f32.mrf.mxu0  ;;  %v953_v1 = vpop.f32.mrf.mxu1 }
 0x193   : > { %v889_v2 = vadd.f32 %v888_v60, %v2579_v5 }
 0x194   : > { %1274 = vmatmul.f32.gmra.mxu2 %v2544_v6  ;;  %1339 = vmatmul.f32.gmra.mxu3 %v2546_v35  ;;  %v2828_v35 = vld [vmem:[#allocation19_spill] sm:$0xff] }
 0x195   : > { %v954_v36 = vadd.f32 %v953_v1, %v889_v2  ;;  %1147 = vmatmul.f32.gmra.mxu0 %v2824_v8  ;;  %1212 = vmatmul.f32.gmra.mxu1 %v2825_v10 }
 0x197   : > { %v1015_v11 = vpop.f32.mrf.mxu2  ;;  %v1080_v16 = vpop.f32.mrf.mxu3 }
 0x198   : > { %v1016_v17 = vadd.f32 %v1015_v11, %v951_v19 }
 0x19a   : > { %v2682_v12 = vadd.f32 %v1080_v16, %v1016_v17  ;;  %v891_v13 = vpop.f32.mrf.mxu0  ;;  %v956_v14 = vpop.f32.mrf.mxu1 }
 0x19b   : > { %v892_v31 = vadd.f32 %v891_v13, %v2579_v5  ;;  %v2832_v5 = vld [vmem:[#allocation21_spill] sm:$0xff] }
 0x19c   : > { %1277 = vmatmul.f32.gmra.mxu2 %v2826_v32  ;;  %1342 = vmatmul.f32.gmra.mxu3 %v2827_v33  ;;  %v2694_v27 = vperm.slane %v2832_v5, 1 }
 0x19d   : > { %v957_v6 = vadd.f32 %v956_v14, %v892_v31  ;;  %1150 = vmatmul.f32.gmra.mxu0 %v2828_v35  ;;  %1215 = vmatmul.f32.gmra.mxu1 %v2829_v34 }
 0x19f   : > { %v1018_v39 = vpop.f32.mrf.mxu2  ;;  %v1083_v40 = vpop.f32.mrf.mxu3 }
 0x1a0   : > { %v1019_v46 = vadd.f32 %v1018_v39, %v954_v36 }
 0x1a2   : > { %v2689_v50 = vadd.f32 %v1083_v40, %v1019_v46  ;;  %v1106_v51 = vpop.f32.mrf.mxu0  ;;  %v1171_v56 = vpop.f32.mrf.mxu1 }
 0x1a3   : > { %v1107_v21 = vadd.f32 %v1106_v51, %v2694_v27 }
 0x1a4   : > { %1280 = vmatmul.f32.gmra.mxu2 %v2830_v61  ;;  %1345 = vmatmul.f32.gmra.mxu3 %v2831_v26 }
 0x1a5   : > { %v1172_v38 = vadd.f32 %v1171_v56, %v1107_v21 }
 0x1a7   : > { %v1021_v28 = vpop.f32.mrf.mxu2  ;;  %v1086_v9 = vpop.f32.mrf.mxu3 }
 0x1a8   : > { %v1022_v18 = vadd.f32 %v1021_v28, %v957_v6 }
 0x1aa   : > { %v2697_v22 = vadd.f32 %v1086_v9, %v1022_v18  ;;  %v1109_v52 = vpop.f32.mrf.mxu0  ;;  %v1174_v53 = vpop.f32.mrf.mxu1 }
 0x1ab   : > { %v1110_v55 = vadd.f32 %v1109_v52, %v2694_v27 }
 0x1ad   : > { %v1175_v63 = vadd.f32 %v1174_v53, %v1110_v55 }
 0x1af   : > { %v1236_v44 = vpop.f32.mrf.mxu2  ;;  %v1301_v45 = vpop.f32.mrf.mxu3 }
 0x1b0   : > { %v1237_v54 = vadd.f32 %v1236_v44, %v1172_v38 }
 0x1b2   : > { %v1302_v42 = vadd.f32 %v1301_v45, %v1237_v54  ;;  %v1112_v43 = vpop.f32.mrf.mxu0  ;;  %v1177_v3 = vpop.f32.mrf.mxu1 }
 0x1b3   : > { %v1113_v29 = vadd.f32 %v1112_v43, %v2694_v27 }
 0x1b4   : > { %v1874_v62 = vmul.f32 -1.442695, %v1302_v42 }
 0x1b5   : > { %v1178_v8 = vadd.f32 %v1177_v3, %v1113_v29 }
 0x1b6   : > { %1962 = vpow2.f32 %v1874_v62 }
 0x1b7   : > { %v1239_v19 = vpop.f32.mrf.mxu2  ;;  %v1304_v20 = vpop.f32.mrf.mxu3 }
 0x1b8   : > { %v1240_v57 = vadd.f32 %v1239_v19, %v1175_v63 }
 0x1ba   : > { %v1305_v30 = vadd.f32 %v1304_v20, %v1240_v57  ;;  %v1115_v58 = vpop.f32.mrf.mxu0  ;;  %v1180_v60 = vpop.f32.mrf.mxu1 }
 0x1bb   : > { %v1116_v17 = vadd.f32 %v1115_v58, %v2694_v27 }
 0x1bc   : > { %v1963_v1 = vpop.eup %1962  ;;  %v1875_v2 = vmul.f32 -1.442695, %v1305_v30 }
 0x1bd   : > { %v1397_v36 = vadd.f32 1.0, %v1963_v1  ;;  %v1181_v39 = vadd.f32 %v1180_v60, %v1116_v17 }
 0x1be   : > { %1964 = vpow2.f32 %v1875_v2 }
 0x1bf   : > { %1966 = vrcp.f32 %v1397_v36  ;;  %v1242_v10 = vpop.f32.mrf.mxu2  ;;  %v1307_v11 = vpop.f32.mrf.mxu3  ;;  %v1422_v61 = vand.u32 2147483647, %v1397_v36  ;;  %v1424_v26 = vand.u32 2147483648, %v1397_v36  ;;  %vm1418_vm2 = vweird.f32 %v1397_v36 }
 0x1c0   : > { %v1243_v16 = vadd.f32 %v1242_v10, %v1178_v8 }
 0x1c1   : > { %vm1423_vm4 = vcmp.eq.f32.partialorder %v1422_v61, 8.507059e+37  ;;  %v1425_v45 = vor.u32 1.1754944e-38, %v1424_v26 }
 0x1c2   : > { %v1308_v13 = vadd.f32 %v1307_v11, %v1243_v16  ;;  %v1118_v14 = vpop.f32.mrf.mxu0  ;;  %v1183_v31 = vpop.f32.mrf.mxu1 }
 0x1c3   : > { %v1119_v28 = vadd.f32 %v1118_v14, %v2694_v27 }
 0x1c4   : > { %v1965_v32 = vpop.eup %1964  ;;  %v1876_v33 = vmul.f32 -1.442695, %v1308_v13 }
 0x1c5   : > { %v1967_v6 = vpop.eup %1966  ;;  %v1398_v35 = vadd.f32 1.0, %v1965_v32  ;;  %v1184_v43 = vadd.f32 %v1183_v31, %v1119_v28 }
 0x1c6   : > { %v1414_v34 = vmul.f32 %v1967_v6, %v1397_v36  ;;  %1968 = vpow2.f32 %v1876_v33  ;;  %vm1419_vm1 = vweird.f32 %v1967_v6 }
 0x1c7   : > { %1970 = vrcp.f32 %v1398_v35  ;;  %v1245_v40 = vpop.f32.mrf.mxu2  ;;  %v1310_v46 = vpop.f32.mrf.mxu3  ;;  %vm1420_vm3 = vmor %vm1418_vm2, %vm1419_vm1  ;;  %v1437_v29 = vand.u32 2147483647, %v1398_v35  ;;  %v1439_v30 = vand.u32 2147483648, %v1398_v35  ;;  %vm1433_vm6 = vweird.f32 %v1398_v35 }
 0x1c8   : > { %v1415_v51 = vsub.f32 1.0, %v1414_v34  ;;  %v1246_v56 = vadd.f32 %v1245_v40, %v1181_v39 }
 0x1c9   : > { %vm1438_vm8 = vcmp.eq.f32.partialorder %v1437_v29, 8.507059e+37  ;;  %v1440_v16 = vor.u32 1.1754944e-38, %v1439_v30 }
 0x1ca   : > { %v1416_v5 = vmul.f32 %v1967_v6, %v1415_v51  ;;  %v1311_v9 = vadd.f32 %v1310_v46, %v1246_v56  ;;  %v1121_v18 = vpop.f32.mrf.mxu0  ;;  %v1186_v21 = vpop.f32.mrf.mxu1 }
 0x1cb   : > { %v1122_v60 = vadd.f32 %v1121_v18, %v2694_v27 }
 0x1cc   : > { %v1969_v52 = vpop.eup %1968  ;;  %v1417_v53 = vadd.f32 %v1967_v6, %v1416_v5  ;;  %v1877_v38 = vmul.f32 -1.442695, %v1311_v9 }
 0x1cd   : > { %v1971_v44 = vpop.eup %1970  ;;  %v1399_v54 = vadd.f32 1.0, %v1969_v52  ;;  %v1187_v31 = vadd.f32 %v1186_v21, %v1122_v60 }
 0x1ce   : > { %v1421_v55 = vsel %vm1420_vm3, %v1967_v6, %v1417_v53  ;;  %v1429_v42 = vmul.f32 %v1971_v44, %v1398_v35  ;;  %1972 = vpow2.f32 %v1877_v38  ;;  %vm1434_vm5 = vweird.f32 %v1971_v44 }
 0x1cf   : > { %v1426_v3 = vsel %vm1423_vm4, %v1425_v45, %v1421_v55  ;;  %1974 = vrcp.f32 %v1399_v54  ;;  %v1248_v62 = vpop.f32.mrf.mxu2  ;;  %v1313_v63 = vpop.f32.mrf.mxu3  ;;  %vm1435_vm7 = vmor %vm1433_vm6, %vm1434_vm5  ;;  %v1452_v35 = vand.u32 2147483647, %v1399_v54  ;;  %v1454_v46 = vand.u32 2147483648, %v1399_v54 }
 0x1d0   : > { %v1653_v19 = vmul.f32 %v1426_v3, %v2591_v37  ;;  %v1430_v20 = vsub.f32 1.0, %v1429_v42  ;;  %v1249_v57 = vadd.f32 %v1248_v62, %v1184_v43  ;;  %vm1448_vm10 = vweird.f32 %v1399_v54 }
 0x1d1   : > { %vm1453_vm12 = vcmp.eq.f32.partialorder %v1452_v35, 8.507059e+37 }
 0x1d2   : > { %1669 = vst [vmem:[%s2707_s16] sm:$0xff] %v1653_v19  ;;  %v1431_v58 = vmul.f32 %v1971_v44, %v1430_v20  ;;  %v1314_v1 = vadd.f32 %v1313_v63, %v1249_v57  ;;  %v1124_v2 = vpop.f32.mrf.mxu0  ;;  %v1189_v36 = vpop.f32.mrf.mxu1 }
 0x1d3   : > { %v1125_v56 = vadd.f32 %v1124_v2, %v2694_v27 }
 0x1d4   : > { %v1973_v8 = vpop.eup %1972  ;;  %v1432_v10 = vadd.f32 %v1971_v44, %v1431_v58  ;;  %v1878_v11 = vmul.f32 -1.442695, %v1314_v1 }
 0x1d5   : > { %v1975_v37 = vpop.eup %1974  ;;  %v1400_v17 = vadd.f32 1.0, %v1973_v8 }
 0x1d6   : > { %v1436_v13 = vsel %vm1435_vm7, %v1971_v44, %v1432_v10  ;;  %v1444_v14 = vmul.f32 %v1975_v37, %v1399_v54  ;;  %1976 = vpow2.f32 %v1878_v11  ;;  %vm1449_vm9 = vweird.f32 %v1975_v37 }
 0x1d7   : > { %v1441_v32 = vsel %vm1438_vm8, %v1440_v16, %v1436_v13  ;;  %1978 = vrcp.f32 %v1400_v17  ;;  %v1251_v33 = vpop.f32.mrf.mxu2  ;;  %v1316_v6 = vpop.f32.mrf.mxu3  ;;  %vm1450_vm11 = vmor %vm1448_vm10, %vm1449_vm9  ;;  %v1190_v44 = vadd.f32 %v1189_v36, %v1125_v56  ;;  %v1467_v54 = vand.u32 2147483647, %v1400_v17 }
 0x1d8   : > { %v1654_v34 = vmul.f32 %v1441_v32, %v2598_v4  ;;  %v1445_v39 = vsub.f32 1.0, %v1444_v14  ;;  %v1252_v40 = vadd.f32 %v1251_v33, %v1187_v31  ;;  %v1455_v4 = vor.u32 1.1754944e-38, %v1454_v46 }
 0x1d9   : > { %v1469_v63 = vand.u32 2147483648, %v1400_v17  ;;  %vm1463_vm14 = vweird.f32 %v1400_v17  ;;  %vm1468_vm0 = vcmp.eq.f32.partialorder %v1467_v54, 8.507059e+37 }
 0x1da   : > { %1670 = vst [vmem:[%s2707_s16 + $0x8] sm:$0xff] %v1654_v34  ;;  %v1446_v51 = vmul.f32 %v1975_v37, %v1445_v39  ;;  %v1317_v61 = vadd.f32 %v1316_v6, %v1252_v40  ;;  %v1127_v26 = vpop.f32.mrf.mxu0  ;;  %v1192_v5 = vpop.f32.mrf.mxu1 }
 0x1db   : > { %v1128_v20 = vadd.f32 %v1127_v26, %v2694_v27 }
 0x1dc   : > { %v1977_v28 = vpop.eup %1976  ;;  %v1447_v9 = vadd.f32 %v1975_v37, %v1446_v51  ;;  %v1879_v18 = vmul.f32 -1.442695, %v1317_v61 }
 0x1dd   : > { %v1979_v21 = vpop.eup %1978  ;;  %v1401_v52 = vadd.f32 1.0, %v1977_v28  ;;  %v1193_v11 = vadd.f32 %v1192_v5, %v1128_v20 }
 0x1de   : > { %v1451_v53 = vsel %vm1450_vm11, %v1975_v37, %v1447_v9  ;;  %v1459_v38 = vmul.f32 %v1979_v21, %v1400_v17  ;;  %1980 = vpow2.f32 %v1879_v18  ;;  %vm1464_vm13 = vweird.f32 %v1979_v21 }
 0x1df   : > { %v1456_v45 = vsel %vm1453_vm12, %v1455_v4, %v1451_v53  ;;  %1982 = vrcp.f32 %v1401_v52  ;;  %v1254_v55 = vpop.f32.mrf.mxu2  ;;  %v1319_v42 = vpop.f32.mrf.mxu3  ;;  %vm1465_vm15 = vmor %vm1463_vm14, %vm1464_vm13  ;;  %v1482_v17 = vand.u32 2147483647, %v1401_v52  ;;  %v1484_v33 = vand.u32 2147483648, %v1401_v52 }
 0x1e0   : > { %v1655_v43 = vmul.f32 %v1456_v45, %v2605_v23  ;;  %v1460_v3 = vsub.f32 1.0, %v1459_v38  ;;  %v1255_v62 = vadd.f32 %v1254_v55, %v1190_v44  ;;  %v1470_v23 = vor.u32 1.1754944e-38, %v1469_v63 }
 0x1e1   : > { %vm1478_vm2 = vweird.f32 %v1401_v52  ;;  %vm1483_vm4 = vcmp.eq.f32.partialorder %v1482_v17, 8.507059e+37 }
 0x1e2   : > { %1671 = vst [vmem:[%s2707_s16 + $0x10] sm:$0xff] %v1655_v43  ;;  %v1461_v19 = vmul.f32 %v1979_v21, %v1460_v3  ;;  %v1320_v57 = vadd.f32 %v1319_v42, %v1255_v62  ;;  %v1130_v29 = vpop.f32.mrf.mxu0  ;;  %v1195_v30 = vpop.f32.mrf.mxu1 }
 0x1e3   : > { %v1131_v34 = vadd.f32 %v1130_v29, %v2694_v27 }
 0x1e4   : > { %v1981_v58 = vpop.eup %1980  ;;  %v1462_v60 = vadd.f32 %v1979_v21, %v1461_v19  ;;  %v1880_v1 = vmul.f32 -1.442695, %v1320_v57 }
 0x1e5   : > { %v1983_v2 = vpop.eup %1982  ;;  %v1402_v36 = vadd.f32 1.0, %v1981_v58  ;;  %v1196_v9 = vadd.f32 %v1195_v30, %v1131_v34 }
 0x1e6   : > { %v1466_v8 = vsel %vm1465_vm15, %v1979_v21, %v1462_v60  ;;  %v1474_v10 = vmul.f32 %v1983_v2, %v1401_v52  ;;  %1984 = vpow2.f32 %v1880_v1  ;;  %vm1479_vm1 = vweird.f32 %v1983_v2 }
 0x1e7   : > { %v1471_v37 = vsel %vm1468_vm0, %v1470_v23, %v1466_v8  ;;  %1986 = vrcp.f32 %v1402_v36  ;;  %v1257_v16 = vpop.f32.mrf.mxu2  ;;  %v1322_v13 = vpop.f32.mrf.mxu3  ;;  %vm1480_vm3 = vmor %vm1478_vm2, %vm1479_vm1  ;;  %v1497_v52 = vand.u32 2147483647, %v1402_v36  ;;  %v1499_v45 = vand.u32 2147483648, %v1402_v36 }
 0x1e8   : > { %v1656_v14 = vmul.f32 %v1471_v37, %v2612_v7  ;;  %v1475_v31 = vsub.f32 1.0, %v1474_v10  ;;  %v1258_v32 = vadd.f32 %v1257_v16, %v1193_v11  ;;  %v1485_v7 = vor.u32 1.1754944e-38, %v1484_v33 }
 0x1e9   : > { %vm1493_vm6 = vweird.f32 %v1402_v36  ;;  %vm1498_vm8 = vcmp.eq.f32.partialorder %v1497_v52, 8.507059e+37 }
 0x1ea   : > { %1672 = vst [vmem:[%s2707_s16 + $0x18] sm:$0xff] %v1656_v14  ;;  %v1476_v6 = vmul.f32 %v1983_v2, %v1475_v31  ;;  %v1323_v39 = vadd.f32 %v1322_v13, %v1258_v32  ;;  %v1133_v40 = vpop.f32.mrf.mxu0  ;;  %v1198_v35 = vpop.f32.mrf.mxu1 }
 0x1eb   : > { %v1134_v42 = vadd.f32 %v1133_v40, %v2694_v27 }
 0x1ec   : > { %v1985_v46 = vpop.eup %1984  ;;  %v1477_v51 = vadd.f32 %v1983_v2, %v1476_v6  ;;  %v1881_v56 = vmul.f32 -1.442695, %v1323_v39 }
 0x1ed   : > { %v1987_v61 = vpop.eup %1986  ;;  %v1403_v26 = vadd.f32 1.0, %v1985_v46  ;;  %v1199_v58 = vadd.f32 %v1198_v35, %v1134_v42 }
 0x1ee   : > { %v1481_v5 = vsel %vm1480_vm3, %v1983_v2, %v1477_v51  ;;  %v1489_v28 = vmul.f32 %v1987_v61, %v1402_v36  ;;  %1988 = vpow2.f32 %v1881_v56  ;;  %vm1494_vm5 = vweird.f32 %v1987_v61 }
 0x1ef   : > { %v1486_v18 = vsel %vm1483_vm4, %v1485_v7, %v1481_v5  ;;  %1990 = vrcp.f32 %v1403_v26  ;;  %v1260_v21 = vpop.f32.mrf.mxu2  ;;  %v1325_v4 = vpop.f32.mrf.mxu3  ;;  %vm1495_vm7 = vmor %vm1493_vm6, %vm1494_vm5  ;;  %v1512_v36 = vand.u32 2147483647, %v1403_v26  ;;  %v1514_v11 = vand.u32 2147483648, %v1403_v26 }
 0x1f0   : > { %v1657_v53 = vmul.f32 %v1486_v18, %v2619_v48  ;;  %v1490_v38 = vsub.f32 1.0, %v1489_v28  ;;  %v1261_v44 = vadd.f32 %v1260_v21, %v1196_v9  ;;  %v1500_v48 = vor.u32 1.1754944e-38, %v1499_v45 }
 0x1f1   : > { %vm1508_vm10 = vweird.f32 %v1403_v26  ;;  %vm1513_vm12 = vcmp.eq.f32.partialorder %v1512_v36, 8.507059e+37 }
 0x1f2   : > { %1673 = vst [vmem:[%s2707_s16 + $0x20] sm:$0xff] %v1657_v53  ;;  %v1491_v55 = vmul.f32 %v1987_v61, %v1490_v38  ;;  %v1326_v43 = vadd.f32 %v1325_v4, %v1261_v44  ;;  %v1136_v3 = vpop.f32.mrf.mxu0  ;;  %v1201_v62 = vpop.f32.mrf.mxu1 }
 0x1f3   : > { %v1137_v16 = vadd.f32 %v1136_v3, %v2694_v27 }
 0x1f4   : > { %v1989_v54 = vpop.eup %1988  ;;  %v1492_v63 = vadd.f32 %v1987_v61, %v1491_v55  ;;  %v1882_v19 = vmul.f32 -1.442695, %v1326_v43 }
 0x1f5   : > { %v1991_v20 = vpop.eup %1990  ;;  %v1404_v57 = vadd.f32 1.0, %v1989_v54  ;;  %v1202_v35 = vadd.f32 %v1201_v62, %v1137_v16 }
 0x1f6   : > { %v1496_v29 = vsel %vm1495_vm7, %v1987_v61, %v1492_v63  ;;  %v1504_v30 = vmul.f32 %v1991_v20, %v1403_v26  ;;  %1992 = vpow2.f32 %v1882_v19  ;;  %vm1509_vm9 = vweird.f32 %v1991_v20 }
 0x1f7   : > { %v1501_v60 = vsel %vm1498_vm8, %v1500_v48, %v1496_v29  ;;  %1994 = vrcp.f32 %v1404_v57  ;;  %v1263_v1 = vpop.f32.mrf.mxu2  ;;  %v1328_v2 = vpop.f32.mrf.mxu3  ;;  %vm1510_vm11 = vmor %vm1508_vm10, %vm1509_vm9  ;;  %v1527_v5 = vand.u32 2147483647, %v1404_v57  ;;  %v1529_v28 = vand.u32 2147483648, %v1404_v57 }
 0x1f8   : > { %v1658_v23 = vmul.f32 %v1501_v60, %v2626_v47  ;;  %v1505_v8 = vsub.f32 1.0, %v1504_v30  ;;  %v1264_v10 = vadd.f32 %v1263_v1, %v1199_v58  ;;  %v1515_v47 = vor.u32 1.1754944e-38, %v1514_v11 }
 0x1f9   : > { %vm1523_vm14 = vweird.f32 %v1404_v57  ;;  %vm1528_vm0 = vcmp.eq.f32.partialorder %v1527_v5, 8.507059e+37  ;;  %v1530_v45 = vor.u32 1.1754944e-38, %v1529_v28 }
 0x1fa   : > { %1674 = vst [vmem:[%s2707_s16 + $0x28] sm:$0xff] %v1658_v23  ;;  %v1506_v37 = vmul.f32 %v1991_v20, %v1505_v8  ;;  %v1329_v13 = vadd.f32 %v1328_v2, %v1264_v10  ;;  %v1139_v14 = vpop.f32.mrf.mxu0  ;;  %v1204_v33 = vpop.f32.mrf.mxu1 }
 0x1fb   : > { %v1140_v18 = vadd.f32 %v1139_v14, %v2694_v27 }
 0x1fc   : > { %v1993_v31 = vpop.eup %1992  ;;  %v1507_v32 = vadd.f32 %v1991_v20, %v1506_v37  ;;  %v1883_v17 = vmul.f32 -1.442695, %v1329_v13 }
 0x1fd   : > { %v1995_v6 = vpop.eup %1994  ;;  %v1405_v34 = vadd.f32 1.0, %v1993_v31  ;;  %v1205_v43 = vadd.f32 %v1204_v33, %v1140_v18 }
 0x1fe   : > { %v1511_v39 = vsel %vm1510_vm11, %v1991_v20, %v1507_v32  ;;  %v1519_v40 = vmul.f32 %v1995_v6, %v1404_v57  ;;  %1996 = vpow2.f32 %v1883_v17  ;;  %vm1524_vm13 = vweird.f32 %v1995_v6 }
 0x1ff   : > { %v1516_v46 = vsel %vm1513_vm12, %v1515_v47, %v1511_v39  ;;  %1998 = vrcp.f32 %v1405_v34  ;;  %v1266_v51 = vpop.f32.mrf.mxu2  ;;  %v1331_v56 = vpop.f32.mrf.mxu3  ;;  %vm1525_vm15 = vmor %vm1523_vm14, %vm1524_vm13  ;;  %v1542_v57 = vand.u32 2147483647, %v1405_v34  ;;  %v1544_v29 = vand.u32 2147483648, %v1405_v34 }
 0x200   : > { %v1659_v61 = vmul.f32 %v1516_v46, %v2633_v0  ;;  %v1520_v7 = vsub.f32 1.0, %v1519_v40  ;;  %v1267_v26 = vadd.f32 %v1266_v51, %v1202_v35  ;;  %vm1538_vm2 = vweird.f32 %v1405_v34 }
 0x201   : > { %vm1543_vm4 = vcmp.eq.f32.partialorder %v1542_v57, 8.507059e+37  ;;  %v1545_v36 = vor.u32 1.1754944e-38, %v1544_v29 }
 0x202   : > { %1675 = vst [vmem:[%s2707_s16 + $0x30] sm:$0xff] %v1659_v61  ;;  %v1521_v9 = vmul.f32 %v1995_v6, %v1520_v7  ;;  %v1332_v21 = vadd.f32 %v1331_v56, %v1267_v26  ;;  %v1142_v4 = vpop.f32.mrf.mxu0  ;;  %v1207_v3 = vpop.f32.mrf.mxu1 }
 0x203   : > { %v1143_v58 = vadd.f32 %v1142_v4, %v2694_v27 }
 0x204   : > { %v1997_v53 = vpop.eup %1996  ;;  %v1522_v38 = vadd.f32 %v1995_v6, %v1521_v9  ;;  %v1884_v44 = vmul.f32 -1.442695, %v1332_v21 }
 0x205   : > { %v1999_v52 = vpop.eup %1998  ;;  %v1406_v0 = vadd.f32 1.0, %v1997_v53  ;;  %v1208_v16 = vadd.f32 %v1207_v3, %v1143_v58 }
 0x206   : > { %v1526_v55 = vsel %vm1525_vm15, %v1995_v6, %v1522_v38  ;;  %v1534_v42 = vmul.f32 %v1999_v52, %v1405_v34  ;;  %2000 = vpow2.f32 %v1884_v44  ;;  %vm1539_vm1 = vweird.f32 %v1999_v52 }
 0x207   : > { %v1531_v62 = vsel %vm1528_vm0, %v1530_v45, %v1526_v55  ;;  %2002 = vrcp.f32 %v1406_v0  ;;  %v1269_v54 = vpop.f32.mrf.mxu2  ;;  %v1334_v63 = vpop.f32.mrf.mxu3  ;;  %vm1540_vm3 = vmor %vm1538_vm2, %vm1539_vm1  ;;  %v1557_v6 = vand.u32 2147483647, %v1406_v0  ;;  %v1559_v47 = vand.u32 2147483648, %v1406_v0 }
 0x208   : > { %v1660_v19 = vmul.f32 %v1531_v62, %v2640_v24  ;;  %v1535_v20 = vsub.f32 1.0, %v1534_v42  ;;  %v1270_v48 = vadd.f32 %v1269_v54, %v1205_v43  ;;  %vm1553_vm6 = vweird.f32 %v1406_v0 }
 0x209   : > { %vm1558_vm8 = vcmp.eq.f32.partialorder %v1557_v6, 8.507059e+37 }
 0x20a   : > { %1676 = vst [vmem:[%s2707_s16 + $0x38] sm:$0xff] %v1660_v19  ;;  %v1536_v30 = vmul.f32 %v1999_v52, %v1535_v20  ;;  %v1335_v60 = vadd.f32 %v1334_v63, %v1270_v48  ;;  %v1145_v1 = vpop.f32.mrf.mxu0  ;;  %v1210_v34 = vpop.f32.mrf.mxu1 }
 0x20b   : > { %v1146_v40 = vadd.f32 %v1145_v1, %v2694_v27 }
 0x20c   : > { %v2001_v2 = vpop.eup %2000  ;;  %v1537_v23 = vadd.f32 %v1999_v52, %v1536_v30  ;;  %v1885_v8 = vmul.f32 -1.442695, %v1335_v60 }
 0x20d   : > { %v2003_v10 = vpop.eup %2002  ;;  %v1407_v24 = vadd.f32 1.0, %v2001_v2  ;;  %v1211_v9 = vadd.f32 %v1210_v34, %v1146_v40 }
 0x20e   : > { %v1541_v11 = vsel %vm1540_vm3, %v1999_v52, %v1537_v23  ;;  %v1549_v37 = vmul.f32 %v2003_v10, %v1406_v0  ;;  %2004 = vpow2.f32 %v1885_v8  ;;  %vm1554_vm5 = vweird.f32 %v2003_v10 }
 0x20f   : > { %v1546_v13 = vsel %vm1543_vm4, %v1545_v36, %v1541_v11  ;;  %2006 = vrcp.f32 %v1407_v24  ;;  %v1272_v14 = vpop.f32.mrf.mxu2  ;;  %v1337_v31 = vpop.f32.mrf.mxu3  ;;  %vm1555_vm7 = vmor %vm1553_vm6, %vm1554_vm5  ;;  %v1572_v52 = vand.u32 2147483647, %v1407_v24  ;;  %v1574_v45 = vand.u32 2147483648, %v1407_v24 }
 0x210   : > { %v1661_v32 = vmul.f32 %v1546_v13, %v2647_v15  ;;  %v1550_v17 = vsub.f32 1.0, %v1549_v37  ;;  %v1273_v33 = vadd.f32 %v1272_v14, %v1208_v16  ;;  %v1560_v15 = vor.u32 1.1754944e-38, %v1559_v47 }
 0x211   : > { %vm1568_vm10 = vweird.f32 %v1407_v24  ;;  %vm1573_vm12 = vcmp.eq.f32.partialorder %v1572_v52, 8.507059e+37  ;;  %v1575_v19 = vor.u32 1.1754944e-38, %v1574_v45 }
 0x212   : > { %1677 = vst [vmem:[%s2707_s16 + $0x40] sm:$0xff] %v1661_v32  ;;  %v1551_v39 = vmul.f32 %v2003_v10, %v1550_v17  ;;  %v1338_v35 = vadd.f32 %v1337_v31, %v1273_v33  ;;  %v1148_v61 = vpop.f32.mrf.mxu0  ;;  %v1213_v43 = vpop.f32.mrf.mxu1 }
 0x213   : > { %v1149_v55 = vadd.f32 %v1148_v61, %v2694_v27 }
 0x214   : > { %v2005_v46 = vpop.eup %2004  ;;  %v1552_v51 = vadd.f32 %v2003_v10, %v1551_v39  ;;  %v1886_v56 = vmul.f32 -1.442695, %v1338_v35 }
 0x215   : > { %v2007_v7 = vpop.eup %2006  ;;  %v1408_v26 = vadd.f32 1.0, %v2005_v46  ;;  %v1214_v57 = vadd.f32 %v1213_v43, %v1149_v55 }
 0x216   : > { %v1556_v5 = vsel %vm1555_vm7, %v2003_v10, %v1552_v51  ;;  %v1564_v28 = vmul.f32 %v2007_v7, %v1407_v24  ;;  %2008 = vpow2.f32 %v1886_v56  ;;  %vm1569_vm9 = vweird.f32 %v2007_v7 }
 0x217   : > { %v1561_v18 = vsel %vm1558_vm8, %v1560_v15, %v1556_v5  ;;  %2010 = vrcp.f32 %v1408_v26  ;;  %v1275_v21 = vpop.f32.mrf.mxu2  ;;  %v1340_v4 = vpop.f32.mrf.mxu3  ;;  %vm1570_vm11 = vmor %vm1568_vm10, %vm1569_vm9  ;;  %v1587_v8 = vand.u32 2147483647, %v1408_v26  ;;  %v1589_v10 = vand.u32 2147483648, %v1408_v26 }
 0x218   : > { %v1662_v53 = vmul.f32 %v1561_v18, %v2654_v25  ;;  %v1565_v38 = vsub.f32 1.0, %v1564_v28  ;;  %v1276_v44 = vadd.f32 %v1275_v21, %v1211_v9  ;;  %vm1583_vm14 = vweird.f32 %v1408_v26 }
 0x219   : > { %vm1588_vm0 = vcmp.eq.f32.partialorder %v1587_v8, 8.507059e+37  ;;  %v1590_v31 = vor.u32 1.1754944e-38, %v1589_v10 }
 0x21a   : > { %1678 = vst [vmem:[%s2707_s16 + $0x48] sm:$0xff] %v1662_v53  ;;  %v1566_v0 = vmul.f32 %v2007_v7, %v1565_v38  ;;  %v1341_v42 = vadd.f32 %v1340_v4, %v1276_v44  ;;  %v1151_v29 = vpop.f32.mrf.mxu0  ;;  %v1216_v32 = vpop.f32.mrf.mxu1 }
 0x21b   : > { %v1152_v24 = vadd.f32 %v1151_v29, %v2694_v27 }
 0x21c   : > { %v2009_v3 = vpop.eup %2008  ;;  %v1567_v62 = vadd.f32 %v2007_v7, %v1566_v0  ;;  %v1887_v54 = vmul.f32 -1.442695, %v1341_v42 }
 0x21d   : > { %v2011_v63 = vpop.eup %2010  ;;  %v1409_v25 = vadd.f32 1.0, %v2009_v3  ;;  %v1217_v6 = vadd.f32 %v1216_v32, %v1152_v24 }
 0x21e   : > { %v1571_v20 = vsel %vm1570_vm11, %v2007_v7, %v1567_v62  ;;  %v1579_v48 = vmul.f32 %v2011_v63, %v1408_v26  ;;  %2012 = vpow2.f32 %v1887_v54  ;;  %vm1584_vm13 = vweird.f32 %v2011_v63 }
 0x21f   : > { %v1576_v30 = vsel %vm1573_vm12, %v1575_v19, %v1571_v20  ;;  %2014 = vrcp.f32 %v1409_v25  ;;  %v1278_v58 = vpop.f32.mrf.mxu2  ;;  %v1343_v60 = vpop.f32.mrf.mxu3  ;;  %vm1585_vm15 = vmor %vm1583_vm14, %vm1584_vm13  ;;  %v1604_v35 = vand.u32 2147483648, %v1409_v25  ;;  %v1602_v56 = vand.u32 2147483647, %v1409_v25 }
 0x220   : > { %v1663_v1 = vmul.f32 %v1576_v30, %v2661_v49  ;;  %v1580_v2 = vsub.f32 1.0, %v1579_v48  ;;  %v1279_v23 = vadd.f32 %v1278_v58, %v1214_v57  ;;  %vm1598_vm2 = vweird.f32 %v1409_v25 }
 0x221   : > { %v1605_v28 = vor.u32 1.1754944e-38, %v1604_v35  ;;  %vm1603_vm4 = vcmp.eq.f32.partialorder %v1602_v56, 8.507059e+37 }
 0x222   : > { %1679 = vst [vmem:[%s2707_s16 + $0x50] sm:$0xff] %v1663_v1  ;;  %v1581_v36 = vmul.f32 %v2011_v63, %v1580_v2  ;;  %v1344_v11 = vadd.f32 %v1343_v60, %v1279_v23 }
 0x224   : > { %v2013_v37 = vpop.eup %2012  ;;  %v1582_v16 = vadd.f32 %v2011_v63, %v1581_v36  ;;  %v1888_v13 = vmul.f32 -1.442695, %v1344_v11 }
 0x225   : > { %v2015_v14 = vpop.eup %2014  ;;  %v1410_v49 = vadd.f32 1.0, %v2013_v37 }
 0x226   : > { %v1586_v17 = vsel %vm1585_vm15, %v2011_v63, %v1582_v16  ;;  %v1594_v33 = vmul.f32 %v2015_v14, %v1409_v25  ;;  %2016 = vpow2.f32 %v1888_v13  ;;  %vm1599_vm1 = vweird.f32 %v2015_v14 }
 0x227   : > { %v1591_v47 = vsel %vm1588_vm0, %v1590_v31, %v1586_v17  ;;  %2018 = vrcp.f32 %v1410_v49  ;;  %v1281_v34 = vpop.f32.mrf.mxu2  ;;  %v1346_v46 = vpop.f32.mrf.mxu3  ;;  %vm1600_vm3 = vmor %vm1598_vm2, %vm1599_vm1  ;;  %v1619_v38 = vand.u32 2147483648, %v1410_v49  ;;  %v1617_v52 = vand.u32 2147483647, %v1410_v49 }
 0x228   : > { %v1664_v27 = vmul.f32 %v1591_v47, %v2668_v41  ;;  %v1595_v39 = vsub.f32 1.0, %v1594_v33  ;;  %v1282_v40 = vadd.f32 %v1281_v34, %v1217_v6  ;;  %vm1613_vm6 = vweird.f32 %v1410_v49 }
 0x229   : > { %v1620_v42 = vor.u32 1.1754944e-38, %v1619_v38  ;;  %vm1618_vm8 = vcmp.eq.f32.partialorder %v1617_v52, 8.507059e+37 }
 0x22a   : > { %1680 = vst [vmem:[%s2707_s16 + $0x58] sm:$0xff] %v1664_v27  ;;  %v1596_v51 = vmul.f32 %v2015_v14, %v1595_v39  ;;  %v1347_v61 = vadd.f32 %v1346_v46, %v1282_v40 }
 0x22c   : > { %v2017_v7 = vpop.eup %2016  ;;  %v1597_v15 = vadd.f32 %v2015_v14, %v1596_v51  ;;  %v1889_v26 = vmul.f32 -1.442695, %v1347_v61 }
 0x22d   : > { %v2019_v5 = vpop.eup %2018  ;;  %v1411_v9 = vadd.f32 1.0, %v2017_v7 }
 0x22e   : > { %v1601_v18 = vsel %vm1600_vm3, %v2015_v14, %v1597_v15  ;;  %v1609_v41 = vmul.f32 %v2019_v5, %v1410_v49  ;;  %2020 = vpow2.f32 %v1889_v26  ;;  %vm1614_vm5 = vweird.f32 %v2019_v5 }
 0x22f   : > { %v1606_v21 = vsel %vm1603_vm4, %v1605_v28, %v1601_v18  ;;  %2022 = vrcp.f32 %v1411_v9  ;;  %vm1615_vm7 = vmor %vm1613_vm6, %vm1614_vm5  ;;  %v1634_v19 = vand.u32 2147483648, %v1411_v9  ;;  %v1632_v20 = vand.u32 2147483647, %v1411_v9 }
 0x230   : > { %v1665_v4 = vmul.f32 %v1606_v21, %v2675_v59  ;;  %v1610_v53 = vsub.f32 1.0, %v1609_v41  ;;  %vm1628_vm10 = vweird.f32 %v1411_v9 }
 0x231   : > { %v1635_v29 = vor.u32 1.1754944e-38, %v1634_v19  ;;  %vm1633_vm12 = vcmp.eq.f32.partialorder %v1632_v20, 8.507059e+37 }
 0x232   : > { %1681 = vst [vmem:[%s2707_s16 + $0x60] sm:$0xff] %v1665_v4  ;;  %v1611_v44 = vmul.f32 %v2019_v5, %v1610_v53 }
 0x234   : > { %v2021_v45 = vpop.eup %2020  ;;  %v1612_v0 = vadd.f32 %v2019_v5, %v1611_v44 }
 0x235   : > { %v2023_v55 = vpop.eup %2022  ;;  %v1412_v43 = vadd.f32 1.0, %v2021_v45 }
 0x236   : > { %v1616_v3 = vsel %vm1615_vm7, %v2019_v5, %v1612_v0  ;;  %v1624_v62 = vmul.f32 %v2023_v55, %v1411_v9  ;;  %vm1629_vm9 = vweird.f32 %v2023_v55 }
 0x237   : > { %v1621_v54 = vsel %vm1618_vm8, %v1620_v42, %v1616_v3  ;;  %2024 = vrcp.f32 %v1412_v43  ;;  %vm1630_vm11 = vmor %vm1628_vm10, %vm1629_vm9  ;;  %v1649_v2 = vand.u32 2147483648, %v1412_v43  ;;  %v1647_v8 = vand.u32 2147483647, %v1412_v43 }
 0x238   : > { %v1666_v59 = vmul.f32 %v1621_v54, %v2682_v12  ;;  %v1625_v63 = vsub.f32 1.0, %v1624_v62  ;;  %vm1643_vm14 = vweird.f32 %v1412_v43 }
 0x239   : > { %v1650_v36 = vor.u32 1.1754944e-38, %v1649_v2  ;;  %vm1648_vm0 = vcmp.eq.f32.partialorder %v1647_v8, 8.507059e+37 }
 0x23a   : > { %1682 = vst [vmem:[%s2707_s16 + $0x68] sm:$0xff] %v1666_v59  ;;  %v1626_v25 = vmul.f32 %v2023_v55, %v1625_v63 }
 0x23c   : > { %v1627_v48 = vadd.f32 %v2023_v55, %v1626_v25 }
 0x23d   : > { %v2025_v57 = vpop.eup %2024 }
 0x23e   : > { %v1631_v30 = vsel %vm1630_vm11, %v2023_v55, %v1627_v48  ;;  %v1639_v58 = vmul.f32 %v2025_v57, %v1412_v43  ;;  %vm1644_vm13 = vweird.f32 %v2025_v57 }
 0x23f   : > { %v1636_v60 = vsel %vm1633_vm12, %v1635_v29, %v1631_v30  ;;  %vm1645_vm15 = vmor %vm1643_vm14, %vm1644_vm13 }
 0x240   : > { %v1667_v12 = vmul.f32 %v1636_v60, %v2689_v50  ;;  %v1640_v1 = vsub.f32 1.0, %v1639_v58 }
 0x242   : > { %1683 = vst [vmem:[%s2707_s16 + $0x70] sm:$0xff] %v1667_v12  ;;  %v1641_v23 = vmul.f32 %v2025_v57, %v1640_v1 }
 0x244   : > { %v1642_v10 = vadd.f32 %v2025_v57, %v1641_v23 }
 0x246   : > { %v1646_v50 = vsel %vm1645_vm15, %v2025_v57, %v1642_v10 }
 0x247   : > { %v1651_v24 = vsel %vm1648_vm0, %v1650_v36, %v1646_v50 }
 0x248   : > { %v1668_v11 = vmul.f32 %v1651_v24, %v2697_v22 }
 0x24a   : > { %1684 = vst [vmem:[%s2707_s16 + $0x78] sm:$0xff] %v1668_v11 }
 0x24b   : > { %2113 = shalt.err (!%p2110_p8)
}
 0x24c   : > { %s2164_s14 = smov 128   ;;  %s2165_s15 = smov 8  }
 0x24d   : > { %1904 = dma.vmem_to_hbm [thread:$0]  (%p2234_p5), %s1699_s30, 2048, %s1701_s22, %s1686_s6, %s2164_s14, %s2164_s14, %s2165_s15  }
 0x24e PF: > { %p1921_p9 = scmp.ge.s32.totalorder %s2156_s21, 2  ;;  %s1715_s16 = sand.u32 1, %s2144_s18  }
 0x24f   : > { %s1716_s17 = scalar_lea.sflag [#allocation4], %s1715_s16 }
 0x250   : > { %p1914_p10 = pnand %p1921_p9, %p2238_p6 }
 0x252   : > { %p1915_p11 = pneg %p1914_p10 }
 0x254   : > { %2139 = dma.done.wait (%p1915_p11), %s1716_s17, 2048  }
 0x255   : > { %2141 = vsyncadd (%p1915_p11), %s1716_s17, 4294965248  ;;  %p17_p12 = scmp.ge.s32.totalorder %s2221_s24, 4   ;;  %s2833_s18 = smov %s2148_s19 }
 0x256   : > { %s2834_s19 = smov %s2152_s20  ;;  %s2835_s20 = smov %s2232_s27 }
 0x257   : > { %s2836_s21 = smov %s2221_s24  ;;  %19 = sbr.rel (!%p17_p12) target bundleno = 5 (0x5), region = 87 }
 0x25c   :  { %1722 = vsyncpa [#allocation3], 1 }
 0x25d   :  { %1724 = vsyncpa [#allocation3 + $0x1], 1 }
 0x25e   :  { %1725 = vsyncpa [#allocation6], 1 }
 0x25f   :  { %1726 = vsyncpa [#allocation4], 1 }
 0x260   :  { %1728 = vsyncpa [#allocation4 + $0x1], 1 }

</bundles_post_ra>
